<compile_context>
chip_gen: v7x
topology: tpu7x:2x2x1
jax: 0.10.0
libtpu: 0.0.40
codegen_flags: <defaults>
</compile_context>

<pallas_src>
import functools

import jax
import jax.numpy as jnp
import numpy as np
from jax import lax
from jax.experimental import pallas as pl
from jax.experimental.pallas import tpu as pltpu

BN_EPS = 1e-5


def _conv_stats_kernel(p_ref, w_ref, y_ref, stats_ref):
    """Pass 1: conv matmul for one M tile; stash bf16 y + partial BN stats."""
    # [tm, KKCp]bf16 @ [KKCp, Cp]bf16 -> f32 on the MXU.
    y = jnp.dot(p_ref[...], w_ref[...], preferred_element_type=jnp.float32)
    y_ref[...] = y.astype(y_ref.dtype)
    # Padded M rows / padded Cout columns of the operands are exactly zero, so
    # they contribute 0 to the sums -- no masking needed.
    stats_ref[0:1, :] = jnp.sum(y, axis=0, keepdims=True)        # sum
    stats_ref[1:2, :] = jnp.sum(y * y, axis=0, keepdims=True)    # sum of squares
    # Rows 2..7 of the stats block are alignment padding (never read back).


def _bn_prelu_kernel(y_ref, c_ref, out_ref):
    """Pass 2: elementwise folded BN (scale/shift) + per-channel PReLU."""
    y = y_ref[...].astype(jnp.float32)
    c = c_ref[...]              # (8, Cp): row0=scale, row1=shift, row2=alpha
    yb = y * c[0:1, :] + c[1:2, :]
    out_ref[...] = jnp.where(yb >= 0.0, yb, c[2:3, :] * yb).astype(out_ref.dtype)


def _im2col_nhwc(x_nhwc, ksize, stride, padding):
    """Build [N, Ho, Wo, K*K*Cin] patches; feature order is (kh, kw, cin)."""
    n, h, w, c = x_nhwc.shape
    xp = jnp.pad(x_nhwc, ((0, 0), (padding, padding), (padding, padding), (0, 0)))
    ho = (h + 2 * padding - ksize) // stride + 1
    wo = (w + 2 * padding - ksize) // stride + 1
    cols = []
    for kh in range(ksize):
        for kw in range(ksize):
            sl = xp[:, kh:kh + stride * ho:stride, kw:kw + stride * wo:stride, :]
            cols.append(sl)
    patches = jnp.concatenate(cols, axis=-1)  # [N, Ho, Wo, K*K*Cin]
    return patches, ho, wo


def _fit_tile_m(tile_m, kkc_pad, cp, budget_bytes=40 << 20):
    """Shrink tile_m until the double-buffered VMEM footprint fits the budget
    (v7x has only 64 MiB VMEM per TensorCore; v5e/v6e have plenty)."""
    while tile_m > 256:
        pass1 = (2 * tile_m * kkc_pad * 2      # patch tile (bf16, double buffered)
                 + 2 * tile_m * cp * 2         # y stash tile (bf16)
                 + 2 * 8 * cp * 4              # stats tile
                 + 2 * kkc_pad * cp * 2)       # weights
        pass2 = (2 * tile_m * cp * 2           # y stash tile (bf16)
                 + 2 * tile_m * cp * 4         # output tile (f32)
                 + 2 * 8 * cp * 4)             # folded constants
        if max(pass1, pass2) <= budget_bytes:
            break
        tile_m //= 2
    return tile_m


@functools.partial(jax.jit, static_argnames=("ksize", "stride", "tile_m"))
def cbr_forward(x_nchw, conv_w, bn_gamma, bn_beta, prelu_alpha, *,
                ksize, stride, tile_m=1024):
    """CBR forward. x_nchw: [N,Cin,H,W]; conv_w: [Cout,Cin,K,K];
    bn_gamma/bn_beta/prelu_alpha: [Cout]. Returns [N,Cout,Ho,Wo] (f32)."""
    n, cin, h, w = x_nchw.shape
    cout = conv_w.shape[0]
    padding = (ksize - 1) // 2
    cp = max(((cout + 127) // 128) * 128, 128)        # lane-dense padded Cout
    kkc = ksize * ksize * cin
    kkc_pad = max(((kkc + 127) // 128) * 128, 128)    # lane-aligned contraction

    # --- glue: NCHW -> NHWC (bf16) -> im2col patch matrix [M, KKCp] (bf16) ---
    x_nhwc = jnp.transpose(x_nchw, (0, 2, 3, 1)).astype(jnp.bfloat16)
    patches, ho, wo = _im2col_nhwc(x_nhwc, ksize, stride, padding)
    m = n * ho * wo
    p_mat = patches.reshape(m, kkc)

    tile_m = _fit_tile_m(tile_m, kkc_pad, cp)
    nt = (m + tile_m - 1) // tile_m
    m_pad = nt * tile_m
    p_mat = jnp.pad(p_mat, ((0, m_pad - m), (0, kkc_pad - kkc)))

    # Weight [Cout, Cin, KH, KW] -> [KH, KW, Cin, Cout] -> [KKCp, Cp] bf16,
    # zero-padded rows/cols (feature order matches the patch matrix).
    w_mat = jnp.transpose(conv_w, (2, 3, 1, 0)).reshape(kkc, cout)
    w_mat = jnp.pad(w_mat, ((0, kkc_pad - kkc), (0, cp - cout))).astype(jnp.bfloat16)

    cparams = pltpu.CompilerParams(
        dimension_semantics=("parallel",),
        vmem_limit_bytes=48 << 20,
    )
    p_bytes = p_mat.size * 2
    w_bytes = w_mat.size * 2
    y_bytes = m_pad * cp * 2

    # --- pass 1: conv matmul per tile; stash bf16 y + per-tile BN stats ---
    y_stash, stats = pl.pallas_call(
        _conv_stats_kernel,
        out_shape=(
            jax.ShapeDtypeStruct((m_pad, cp), jnp.bfloat16),
            jax.ShapeDtypeStruct((nt, 8, cp), jnp.float32),
        ),
        grid=(nt,),
        in_specs=[
            pl.BlockSpec((tile_m, kkc_pad), lambda i: (i, 0)),
            pl.BlockSpec((kkc_pad, cp), lambda i: (0, 0)),
        ],
        out_specs=(
            pl.BlockSpec((tile_m, cp), lambda i: (i, 0)),
            pl.BlockSpec((None, 8, cp), lambda i: (i, 0, 0)),
        ),
        compiler_params=cparams,
        cost_estimate=pl.CostEstimate(
            flops=2 * m_pad * kkc_pad * cp,
            transcendentals=0,
            bytes_accessed=p_bytes + w_bytes + y_bytes + nt * 8 * cp * 4,
        ),
    )(p_mat, w_mat)

    # --- tiny finalize: global batch mean/var -> folded scale/shift + alpha ---
    s = jnp.sum(stats[:, 0, :cout], axis=0)
    ss = jnp.sum(stats[:, 1, :cout], axis=0)
    mean = s / m
    var = jnp.maximum(ss / m - mean * mean, 0.0)   # biased variance (BN train mode)
    scale = bn_gamma.astype(jnp.float32) * lax.rsqrt(var + BN_EPS)
    shift = bn_beta.astype(jnp.float32) - mean * scale
    alpha = prelu_alpha.astype(jnp.float32)
    consts = jnp.zeros((8, cp), jnp.float32)
    consts = consts.at[0, :cout].set(scale)
    consts = consts.at[1, :cout].set(shift)
    consts = consts.at[2, :cout].set(alpha)

    # --- pass 2: elementwise folded BN + PReLU over the stashed conv result ---
    out = pl.pallas_call(
        _bn_prelu_kernel,
        out_shape=jax.ShapeDtypeStruct((m_pad, cp), jnp.float32),
        grid=(nt,),
        in_specs=[
            pl.BlockSpec((tile_m, cp), lambda i: (i, 0)),
            pl.BlockSpec((8, cp), lambda i: (0, 0)),
        ],
        out_specs=pl.BlockSpec((tile_m, cp), lambda i: (i, 0)),
        compiler_params=cparams,
        cost_estimate=pl.CostEstimate(
            flops=4 * m_pad * cp,
            transcendentals=0,
            bytes_accessed=y_bytes + 8 * cp * 4 + m_pad * cp * 4,
        ),
    )(y_stash, consts)

    # [M, Cp] -> [N, Ho, Wo, Cout] -> NCHW (module semantics are NCHW / f32).
    # Note: for tiny Cout a bf16 output + repacked lane dim would further cut
    # the writeback; kept f32 here to preserve the module's output precision.
    out = out[:m, :cout].reshape(n, ho, wo, cout)
    return jnp.transpose(out, (0, 3, 1, 2)).astype(jnp.float32)


def _reference(x_nchw, conv_w, bn_gamma, bn_beta, prelu_alpha, ksize, stride):
    """Plain-JAX reference matching PyTorch CBR.forward (BN in training mode)."""
    padding = (ksize - 1) // 2
    y = lax.conv_general_dilated(
        x_nchw.astype(jnp.float32),
        conv_w.astype(jnp.float32),
        window_strides=(stride, stride),
        padding=[(padding, padding), (padding, padding)],
        dimension_numbers=("NCHW", "OIHW", "NCHW"),
    )
    mean = jnp.mean(y, axis=(0, 2, 3), keepdims=True)
    var = jnp.mean((y - mean) ** 2, axis=(0, 2, 3), keepdims=True)
    y = (y - mean) / jnp.sqrt(var + BN_EPS)
    y = y * bn_gamma.reshape(1, -1, 1, 1) + bn_beta.reshape(1, -1, 1, 1)
    alpha = prelu_alpha.reshape(1, -1, 1, 1)
    return jnp.where(y >= 0, y, alpha * y)


if __name__ == "__main__":
    # CBR(nIn=4, nOut=8, kSize=3, stride=1, groups=1)
    N, CIN, H, W = 2, 4, 16, 16
    COUT, KSIZE, STRIDE = 8, 3, 1

    key = jax.random.PRNGKey(0)
    kx, kw, kg, kb, ka = jax.random.split(key, 5)

    x = jax.random.normal(kx, (N, CIN, H, W), dtype=jnp.float32)
    conv_w = jax.random.normal(kw, (COUT, CIN, KSIZE, KSIZE), dtype=jnp.float32) * 0.1
    bn_gamma = 1.0 + 0.1 * jax.random.normal(kg, (COUT,), dtype=jnp.float32)
    bn_beta = 0.1 * jax.random.normal(kb, (COUT,), dtype=jnp.float32)
    prelu_alpha = jnp.full((COUT,), 0.25, dtype=jnp.float32)  # PReLU default

    out = cbr_forward(
        x, conv_w, bn_gamma, bn_beta, prelu_alpha,
        ksize=KSIZE, stride=STRIDE,
    )
    out = jax.block_until_ready(out)

    # Reference on bf16-quantized conv inputs (the kernel feeds the MXU bf16
    # operands with f32 accumulation), everything else f32.  Tolerance covers
    # the bf16 stash of the conv result between pass 1 and pass 2 (~1e-2 worst
    # case on the BN-normalized, O(1)-scaled output).
    x_q = x.astype(jnp.bfloat16).astype(jnp.float32)
    w_q = conv_w.astype(jnp.bfloat16).astype(jnp.float32)
    ref = _reference(x_q, w_q, bn_gamma, bn_beta, prelu_alpha, KSIZE, STRIDE)
    np.testing.assert_allclose(np.asarray(out), np.asarray(ref), rtol=2e-2, atol=2e-2)

    print("KERNEL_OK")
</pallas_src>

<mosaic_0001>
module attributes {stable_mosaic.version = 11 : i64} {
  func.func @_conv_stats_kernel(%arg0: i32, %arg1: memref<1024x128xbf16, #tpu.memory_space<vmem>>, %arg2: memref<128x128xbf16, #tpu.memory_space<vmem>>, %arg3: memref<1024x128xbf16, #tpu.memory_space<vmem>>, %arg4: memref<1x8x128xf32, #tpu.memory_space<vmem>>) attributes {dimension_semantics = [#tpu.dimension_semantics<parallel>], iteration_bounds = array<i64: 1>, scalar_prefetch = 0 : i64, scratch_operands = 0 : i64, tpu.core_type = #tpu.core_type<tc>, window_params = [{transform_indices = @transform_0, window_bounds = array<i64: 1024, 128>}, {pipeline_mode = #tpu.pipeline_mode<synchronous>, transform_indices = @transform_1, window_bounds = array<i64: 128, 128>}, {transform_indices = @transform_2, window_bounds = array<i64: 1024, 128>}, {transform_indices = @transform_3, window_bounds = array<i64: 1, 8, 128>}]} {
    %c0 = arith.constant 0 : index
    %c0_0 = arith.constant 0 : index
    %0 = vector.load %arg1[%c0, %c0_0] : memref<1024x128xbf16, #tpu.memory_space<vmem>>, vector<1024x128xbf16>
    %c0_1 = arith.constant 0 : index
    %c0_2 = arith.constant 0 : index
    %1 = vector.load %arg2[%c0_1, %c0_2] : memref<128x128xbf16, #tpu.memory_space<vmem>>, vector<128x128xbf16>
    %cst = arith.constant dense<0.000000e+00> : vector<1024x128xf32>
    %2 = tpu.matmul %0, %1, %cst {dimension_numbers = #tpu.dot_dimension_numbers<[1], [0], [0], [1], [0, 0, 1, 1], [], []>} : vector<1024x128xbf16>, vector<128x128xbf16>, vector<1024x128xf32> -> vector<1024x128xf32>
    %3 = arith.truncf %2 : vector<1024x128xf32> to vector<1024x128xbf16>
    %c0_3 = arith.constant 0 : index
    %c0_4 = arith.constant 0 : index
    %4 = vector.load %arg3[%c0_3, %c0_4] : memref<1024x128xbf16, #tpu.memory_space<vmem>>, vector<1024x128xbf16>
    tpu.vector_store %arg3[%c0_3, %c0_4], %3 {strides = array<i32>} : memref<1024x128xbf16, #tpu.memory_space<vmem>>, vector<1024x128xbf16>,
    %cst_5 = arith.constant dense<0.000000e+00> : vector<128xf32>
    %5 = vector.multi_reduction <add>, %2, %cst_5 [0] : vector<1024x128xf32> to vector<128xf32>
    %6 = vector.shape_cast %5 : vector<128xf32> to vector<1x128xf32>
    %c0_6 = arith.constant 0 : index
    %c0_7 = arith.constant 0 : index
    %c0_8 = arith.constant 0 : index
    %7 = vector.load %arg4[%c0_6, %c0_7, %c0_8] : memref<1x8x128xf32, #tpu.memory_space<vmem>>, vector<1x1x128xf32>
    %8 = vector.shape_cast %7 : vector<1x1x128xf32> to vector<1x128xf32>
    %9 = vector.shape_cast %6 : vector<1x128xf32> to vector<1x1x128xf32>
    tpu.vector_store %arg4[%c0_6, %c0_7, %c0_8], %9 {strides = array<i32>} : memref<1x8x128xf32, #tpu.memory_space<vmem>>, vector<1x1x128xf32>,
    %10 = arith.mulf %2, %2 : vector<1024x128xf32>
    %cst_9 = arith.constant dense<0.000000e+00> : vector<128xf32>
    %11 = vector.multi_reduction <add>, %10, %cst_9 [0] : vector<1024x128xf32> to vector<128xf32>
    %12 = vector.shape_cast %11 : vector<128xf32> to vector<1x128xf32>
    %c0_10 = arith.constant 0 : index
    %c1 = arith.constant 1 : index
    %c0_11 = arith.constant 0 : index
    %13 = vector.load %arg4[%c0_10, %c1, %c0_11] : memref<1x8x128xf32, #tpu.memory_space<vmem>>, vector<1x1x128xf32>
    %14 = vector.shape_cast %13 : vector<1x1x128xf32> to vector<1x128xf32>
    %15 = vector.shape_cast %12 : vector<1x128xf32> to vector<1x1x128xf32>
    tpu.vector_store %arg4[%c0_10, %c1, %c0_11], %15 {strides = array<i32>} : memref<1x8x128xf32, #tpu.memory_space<vmem>>, vector<1x1x128xf32>,
    return
  }
  func.func @transform_0(%arg0: i32) -> (i32, i32) {
    %c0_i32 = arith.constant 0 : i32
    %c0_i32_0 = arith.constant 0 : i32
    return %arg0, %c0_i32 : i32, i32
  }
  func.func @transform_1(%arg0: i32) -> (i32, i32) {
    %c0_i32 = arith.constant 0 : i32
    %c0_i32_0 = arith.constant 0 : i32
    %c0_i32_1 = arith.constant 0 : i32
    return %c0_i32, %c0_i32_0 : i32, i32
  }
  func.func @transform_2(%arg0: i32) -> (i32, i32) {
    %c0_i32 = arith.constant 0 : i32
    %c0_i32_0 = arith.constant 0 : i32
    return %arg0, %c0_i32 : i32, i32
  }
  func.func @transform_3(%arg0: i32) -> (i32, i32, i32) {
    %c0_i32 = arith.constant 0 : i32
    %c0_i32_0 = arith.constant 0 : i32
    %c0_i32_1 = arith.constant 0 : i32
    return %arg0, %c0_i32, %c0_i32_0 : i32, i32, i32
  }
}

module attributes {stable_mosaic.version = 11 : i64} {
  func.func @_bn_prelu_kernel(%arg0: i32, %arg1: memref<1024x128xbf16, #tpu.memory_space<vmem>>, %arg2: memref<8x128xf32, #tpu.memory_space<vmem>>, %arg3: memref<1024x128xf32, #tpu.memory_space<vmem>>) attributes {dimension_semantics = [#tpu.dimension_semantics<parallel>], iteration_bounds = array<i64: 1>, scalar_prefetch = 0 : i64, scratch_operands = 0 : i64, tpu.core_type = #tpu.core_type<tc>, window_params = [{transform_indices = @transform_0, window_bounds = array<i64: 1024, 128>}, {pipeline_mode = #tpu.pipeline_mode<synchronous>, transform_indices = @transform_1, window_bounds = array<i64: 8, 128>}, {transform_indices = @transform_2, window_bounds = array<i64: 1024, 128>}]} {
    %c0 = arith.constant 0 : index
    %c0_0 = arith.constant 0 : index
    %0 = vector.load %arg1[%c0, %c0_0] : memref<1024x128xbf16, #tpu.memory_space<vmem>>, vector<1024x128xbf16>
    %1 = arith.extf %0 : vector<1024x128xbf16> to vector<1024x128xf32>
    %c0_1 = arith.constant 0 : index
    %c0_2 = arith.constant 0 : index
    %2 = vector.load %arg2[%c0_1, %c0_2] : memref<8x128xf32, #tpu.memory_space<vmem>>, vector<8x128xf32>
    %3 = vector.extract_strided_slice %2 {offsets = [0, 0], sizes = [1, 128], strides = [1, 1]} : vector<8x128xf32> to vector<1x128xf32>
    %4 = vector.broadcast %3 : vector<1x128xf32> to vector<1024x128xf32>
    %5 = arith.mulf %1, %4 : vector<1024x128xf32>
    %6 = vector.extract_strided_slice %2 {offsets = [1, 0], sizes = [1, 128], strides = [1, 1]} : vector<8x128xf32> to vector<1x128xf32>
    %7 = vector.broadcast %6 : vector<1x128xf32> to vector<1024x128xf32>
    %8 = arith.addf %5, %7 : vector<1024x128xf32>
    %cst = arith.constant 0.000000e+00 : f32
    %9 = vector.broadcast %cst : f32 to vector<1024x128xf32>
    %10 = arith.cmpf oge, %8, %9 : vector<1024x128xf32>
    %11 = vector.extract_strided_slice %2 {offsets = [2, 0], sizes = [1, 128], strides = [1, 1]} : vector<8x128xf32> to vector<1x128xf32>
    %12 = vector.broadcast %11 : vector<1x128xf32> to vector<1024x128xf32>
    %13 = arith.mulf %12, %8 : vector<1024x128xf32>
    %14 = arith.select %10, %8, %13 : vector<1024x128xi1>, vector<1024x128xf32>
    %c0_3 = arith.constant 0 : index
    %c0_4 = arith.constant 0 : index
    %15 = vector.load %arg3[%c0_3, %c0_4] : memref<1024x128xf32, #tpu.memory_space<vmem>>, vector<1024x128xf32>
    tpu.vector_store %arg3[%c0_3, %c0_4], %14 {strides = array<i32>} : memref<1024x128xf32, #tpu.memory_space<vmem>>, vector<1024x128xf32>,
    return
  }
  func.func @transform_0(%arg0: i32) -> (i32, i32) {
    %c0_i32 = arith.constant 0 : i32
    %c0_i32_0 = arith.constant 0 : i32
    return %arg0, %c0_i32 : i32, i32
  }
  func.func @transform_1(%arg0: i32) -> (i32, i32) {
    %c0_i32 = arith.constant 0 : i32
    %c0_i32_0 = arith.constant 0 : i32
    %c0_i32_1 = arith.constant 0 : i32
    return %c0_i32, %c0_i32_0 : i32, i32
  }
  func.func @transform_2(%arg0: i32) -> (i32, i32) {
    %c0_i32 = arith.constant 0 : i32
    %c0_i32_0 = arith.constant 0 : i32
    return %arg0, %c0_i32 : i32, i32
  }
}

</mosaic_0001>

<bundles_post_ra>
// kernel: cbr_forward.2
= control target key start
LH: loop header
LB: loop body
LE: loop exit
PB: predicated region body
PF: predicated region fallthrough
CT: control target
= control target key end

     0   :  { %s4012_s1 = inlined_call_operand.vmem [shape: bf16[128,128], index: 1, kind: input, shape index: {}]   ;;  %s4013_s0 = inlined_call_operand.vmem [shape: bf16[1024,128], index: 0, kind: input, shape index: {}]   ;;  %s4014_s2 = inlined_call_operand.vmem [shape: bf16[1024,128], index: 2, kind: output, shape index: {0}]   ;;  %s4015_s3 = inlined_call_operand.vmem [shape: f32[1,8,128], index: 3, kind: output, shape index: {1}]  }
   0x1   :  { %v3122_v0 = vld [vmem:[%s4012_s1] sm:$0xff]   ;;  %v3123_v1 = vld [vmem:[%s4012_s1 + $0x8] sm:$0xff]   ;;  %v3124_v2 = vld [vmem:[%s4012_s1 + $0x10] sm:$0xff]  }
   0x2   :  { %2962 = vmatprep.subr.bf16.mxu0 %v3122_v0  ;;  %3106 = vmatprep.subr.bf16.mxu1 %v3122_v0  ;;  %v3125_v3 = vld [vmem:[%s4012_s1 + $0x18] sm:$0xff]   ;;  %v3130_v4 = vld [vmem:[%s4013_s0] sm:$0xff]   ;;  %v3127_v6 = vld [vmem:[%s4012_s1 + $0x28] sm:$0xff]  }
   0x3   :  { %2963 = vmatpush3.bf16.msra.mxu0 %v3122_v0  ;;  %3114 = vmatpush3.bf16.msra.mxu1 %v3122_v0  ;;  %v3126_v5 = vld [vmem:[%s4012_s1 + $0x20] sm:$0xff]   ;;  %v3128_v7 = vld [vmem:[%s4012_s1 + $0x30] sm:$0xff]   ;;  %v3129_v8 = vld [vmem:[%s4012_s1 + $0x38] sm:$0xff]  }
   0x4   :  { %2964 = vmatprep.subr.bf16.mxu0 %v3123_v1  ;;  %3107 = vmatprep.subr.bf16.mxu1 %v3123_v1  ;;  %v3131_v9 = vld [vmem:[%s4013_s0 + $0x8] sm:$0xff]   ;;  %v3132_v10 = vld [vmem:[%s4013_s0 + $0x10] sm:$0xff]   ;;  %v3133_v11 = vld [vmem:[%s4013_s0 + $0x18] sm:$0xff]  }
   0x5   :  { %2978 = vmatprep.mubr.bf16.mxu0 %v3130_v4  ;;  %v3134_v12 = vld [vmem:[%s4013_s0 + $0x20] sm:$0xff]   ;;  %v3163_v14 = vld [vmem:[%s4013_s0 + $0x108] sm:$0xff]   ;;  %v3164_v15 = vld [vmem:[%s4013_s0 + $0x110] sm:$0xff]  }
   0x6   :  { %v3162_v13 = vld [vmem:[%s4013_s0 + $0x100] sm:$0xff]   ;;  %v3135_v16 = vld [vmem:[%s4013_s0 + $0x28] sm:$0xff]   ;;  %v3136_v17 = vld [vmem:[%s4013_s0 + $0x30] sm:$0xff]  }
   0x7   :  { %2965 = vmatpush3.bf16.msra.mxu0 %v3123_v1  ;;  %3115 = vmatpush3.bf16.msra.mxu1 %v3123_v1  ;;  %v3165_v18 = vld [vmem:[%s4013_s0 + $0x118] sm:$0xff]   ;;  %v3166_v19 = vld [vmem:[%s4013_s0 + $0x120] sm:$0xff]   ;;  %v3167_v22 = vld [vmem:[%s4013_s0 + $0x128] sm:$0xff]  }
   0x8   :  { %2966 = vmatprep.subr.bf16.mxu0 %v3124_v2  ;;  %3108 = vmatprep.subr.bf16.mxu1 %v3124_v2  ;;  %v3137_v20 = vld [vmem:[%s4013_s0 + $0x38] sm:$0xff]   ;;  %v3138_v21 = vld [vmem:[%s4013_s0 + $0x40] sm:$0xff]   ;;  %v3168_v23 = vld [vmem:[%s4013_s0 + $0x130] sm:$0xff]  }
   0x9   :  { %3042 = vmatprep.mubr.bf16.mxu1 %v3162_v13  ;;  %v3139_v24 = vld [vmem:[%s4013_s0 + $0x48] sm:$0xff]   ;;  %v3140_v25 = vld [vmem:[%s4013_s0 + $0x50] sm:$0xff]   ;;  %v3169_v26 = vld [vmem:[%s4013_s0 + $0x138] sm:$0xff]  }
   0xa   :  { %v3170_v27 = vld [vmem:[%s4013_s0 + $0x140] sm:$0xff]   ;;  %v3141_v28 = vld [vmem:[%s4013_s0 + $0x58] sm:$0xff]   ;;  %v3171_v30 = vld [vmem:[%s4013_s0 + $0x148] sm:$0xff]  }
   0xb   :  { %2967 = vmatpush3.bf16.msra.mxu0 %v3124_v2  ;;  %3116 = vmatpush3.bf16.msra.mxu1 %v3124_v2  ;;  %v3142_v29 = vld [vmem:[%s4013_s0 + $0x60] sm:$0xff]   ;;  %v3172_v31 = vld [vmem:[%s4013_s0 + $0x150] sm:$0xff]   ;;  %v3143_v32 = vld [vmem:[%s4013_s0 + $0x68] sm:$0xff]  }
   0xc   :  { %2968 = vmatprep.subr.bf16.mxu0 %v3125_v3  ;;  %3109 = vmatprep.subr.bf16.mxu1 %v3125_v3  ;;  %v3144_v33 = vld [vmem:[%s4013_s0 + $0x70] sm:$0xff]   ;;  %v3173_v34 = vld [vmem:[%s4013_s0 + $0x158] sm:$0xff]   ;;  %v3174_v35 = vld [vmem:[%s4013_s0 + $0x160] sm:$0xff]  }
   0xd   :  { %v3145_v36 = vld [vmem:[%s4013_s0 + $0x78] sm:$0xff]   ;;  %v3146_v37 = vld [vmem:[%s4013_s0 + $0x80] sm:$0xff]   ;;  %v3175_v38 = vld [vmem:[%s4013_s0 + $0x168] sm:$0xff]  }
   0xe   :  { %v3176_v39 = vld [vmem:[%s4013_s0 + $0x170] sm:$0xff]   ;;  %v3147_v40 = vld [vmem:[%s4013_s0 + $0x88] sm:$0xff]   ;;  %v3177_v42 = vld [vmem:[%s4013_s0 + $0x178] sm:$0xff]  }
   0xf   :  { %2969 = vmatpush3.bf16.msra.mxu0 %v3125_v3  ;;  %3117 = vmatpush3.bf16.msra.mxu1 %v3125_v3  ;;  %v3148_v41 = vld [vmem:[%s4013_s0 + $0x90] sm:$0xff]   ;;  %v3178_v43 = vld [vmem:[%s4013_s0 + $0x180] sm:$0xff]   ;;  %v3149_v44 = vld [vmem:[%s4013_s0 + $0x98] sm:$0xff]  }
  0x10   :  { %2970 = vmatprep.subr.bf16.mxu0 %v3126_v5  ;;  %3110 = vmatprep.subr.bf16.mxu1 %v3126_v5  ;;  %v3150_v45 = vld [vmem:[%s4013_s0 + $0xa0] sm:$0xff]   ;;  %v3179_v46 = vld [vmem:[%s4013_s0 + $0x188] sm:$0xff]   ;;  %v3180_v47 = vld [vmem:[%s4013_s0 + $0x190] sm:$0xff]  }
  0x11   :  { %v3151_v48 = vld [vmem:[%s4013_s0 + $0xa8] sm:$0xff]   ;;  %v3152_v49 = vld [vmem:[%s4013_s0 + $0xb0] sm:$0xff]   ;;  %v3181_v50 = vld [vmem:[%s4013_s0 + $0x198] sm:$0xff]  }
  0x12   :  { %v3182_v51 = vld [vmem:[%s4013_s0 + $0x1a0] sm:$0xff]   ;;  %v3153_v52 = vld [vmem:[%s4013_s0 + $0xb8] sm:$0xff]   ;;  %v3183_v54 = vld [vmem:[%s4013_s0 + $0x1a8] sm:$0xff]  }
  0x13   :  { %2971 = vmatpush3.bf16.msra.mxu0 %v3126_v5  ;;  %3118 = vmatpush3.bf16.msra.mxu1 %v3126_v5  ;;  %v3154_v53 = vld [vmem:[%s4013_s0 + $0xc0] sm:$0xff]   ;;  %v3184_v55 = vld [vmem:[%s4013_s0 + $0x1b0] sm:$0xff]   ;;  %v3155_v56 = vld [vmem:[%s4013_s0 + $0xc8] sm:$0xff]  }
  0x14   :  { %2972 = vmatprep.subr.bf16.mxu0 %v3127_v6  ;;  %3111 = vmatprep.subr.bf16.mxu1 %v3127_v6  ;;  %v3156_v57 = vld [vmem:[%s4013_s0 + $0xd0] sm:$0xff]   ;;  %v3185_v58 = vld [vmem:[%s4013_s0 + $0x1b8] sm:$0xff]   ;;  %v3186_v59 = vld [vmem:[%s4013_s0 + $0x1c0] sm:$0xff]  }
  0x15   :  { %v3157_v60 = vld [vmem:[%s4013_s0 + $0xd8] sm:$0xff]   ;;  %v3158_v61 = vld [vmem:[%s4013_s0 + $0xe0] sm:$0xff]   ;;  %v3187_v62 = vld [vmem:[%s4013_s0 + $0x1c8] sm:$0xff]  }
  0x16   :  { %v3188_v63 = vld [vmem:[%s4013_s0 + $0x1d0] sm:$0xff]   ;;  %v3159_v0 = vld [vmem:[%s4013_s0 + $0xe8] sm:$0xff]   ;;  %v3189_v2 = vld [vmem:[%s4013_s0 + $0x1d8] sm:$0xff]  }
  0x17   :  { %2973 = vmatpush3.bf16.msra.mxu0 %v3127_v6  ;;  %3119 = vmatpush3.bf16.msra.mxu1 %v3127_v6  ;;  %v3160_v1 = vld [vmem:[%s4013_s0 + $0xf0] sm:$0xff]   ;;  %v3190_v3 = vld [vmem:[%s4013_s0 + $0x1e0] sm:$0xff]   ;;  %v3161_v4 = vld [vmem:[%s4013_s0 + $0xf8] sm:$0xff]  }
  0x18   :  { %2974 = vmatprep.subr.bf16.mxu0 %v3128_v7  ;;  %3112 = vmatprep.subr.bf16.mxu1 %v3128_v7  ;;  %v3191_v5 = vld [vmem:[%s4013_s0 + $0x1e8] sm:$0xff]   ;;  %v3192_v6 = vld [vmem:[%s4013_s0 + $0x1f0] sm:$0xff]  }
  0x1b   :  { %2975 = vmatpush3.bf16.msra.mxu0 %v3128_v7  ;;  %3120 = vmatpush3.bf16.msra.mxu1 %v3128_v7  ;;  %v3193_v7 = vld [vmem:[%s4013_s0 + $0x1f8] sm:$0xff]  }
  0x1c   :  { %2976 = vmatprep.subr.bf16.mxu0 %v3129_v8  ;;  %3113 = vmatprep.subr.bf16.mxu1 %v3129_v8 }
  0x1f   :  { %2977 = vmatpush3.bf16.msra.mxu0 %v3129_v8  ;;  %3121 = vmatpush3.bf16.msra.mxu1 %v3129_v8 }
  0x22   :  { %2979 = vmatmul.mubr.bf16.vlgmr.msra.gmra.mrb[0].mxu0 %v3131_v9  ;;  %3043 = vmatmul.mubr.bf16.vlgmr.msra.gmra.mrb[0].mxu1 %v3163_v14 }
  0x23   :  { %2982 = vmatprep.mubr.bf16.mxu0 %v3132_v10  ;;  %3046 = vmatprep.mubr.bf16.mxu1 %v3164_v15 }
  0x2a   :  { %2983 = vmatmul.mubr.bf16.gmra.mrb[4].mxu0 %v3133_v11  ;;  %3047 = vmatmul.mubr.bf16.gmra.mrb[4].mxu1 %v3165_v18 }
  0x2b   :  { %2986 = vmatprep.mubr.bf16.mxu0 %v3134_v12  ;;  %3050 = vmatprep.mubr.bf16.mxu1 %v3166_v19 }
  0x32   :  { %2987 = vmatmul.mubr.bf16.gmra.mrb[8].mxu0 %v3135_v16  ;;  %3051 = vmatmul.mubr.bf16.gmra.mrb[8].mxu1 %v3167_v22 }
  0x33   :  { %2990 = vmatprep.mubr.bf16.mxu0 %v3136_v17  ;;  %3054 = vmatprep.mubr.bf16.mxu1 %v3168_v23 }
  0x3a   :  { %2991 = vmatmul.mubr.bf16.gmra.mrb[12].mxu0 %v3137_v20  ;;  %3055 = vmatmul.mubr.bf16.gmra.mrb[12].mxu1 %v3169_v26 }
  0x3b   :  { %2994 = vmatprep.mubr.bf16.mxu0 %v3138_v21  ;;  %3058 = vmatprep.mubr.bf16.mxu1 %v3170_v27 }
  0x42   :  { %2995 = vmatmul.mubr.bf16.gmra.mrb[16].mxu0 %v3139_v24  ;;  %3059 = vmatmul.mubr.bf16.gmra.mrb[16].mxu1 %v3171_v30 }
  0x43   :  { %2998 = vmatprep.mubr.bf16.mxu0 %v3140_v25  ;;  %3062 = vmatprep.mubr.bf16.mxu1 %v3172_v31 }
  0x4a   :  { %2999 = vmatmul.mubr.bf16.gmra.mrb[20].mxu0 %v3141_v28  ;;  %3063 = vmatmul.mubr.bf16.gmra.mrb[20].mxu1 %v3173_v34 }
  0x4b   :  { %3002 = vmatprep.mubr.bf16.mxu0 %v3142_v29  ;;  %3066 = vmatprep.mubr.bf16.mxu1 %v3174_v35 }
  0x52   :  { %3003 = vmatmul.mubr.bf16.gmra.mrb[24].mxu0 %v3143_v32  ;;  %3067 = vmatmul.mubr.bf16.gmra.mrb[24].mxu1 %v3175_v38 }
  0x53   :  { %3006 = vmatprep.mubr.bf16.mxu0 %v3144_v33  ;;  %3070 = vmatprep.mubr.bf16.mxu1 %v3176_v39 }
  0x5a   :  { %3007 = vmatmul.mubr.bf16.gmra.mrb[28].mxu0 %v3145_v36  ;;  %3071 = vmatmul.mubr.bf16.gmra.mrb[28].mxu1 %v3177_v42 }
  0x5b   :  { %3010 = vmatprep.mubr.bf16.mxu0 %v3146_v37  ;;  %3074 = vmatprep.mubr.bf16.mxu1 %v3178_v43 }
  0x62   :  { %3011 = vmatmul.mubr.bf16.gmra.mrb[32].mxu0 %v3147_v40  ;;  %3075 = vmatmul.mubr.bf16.gmra.mrb[32].mxu1 %v3179_v46 }
  0x63   :  { %3014 = vmatprep.mubr.bf16.mxu0 %v3148_v41  ;;  %3078 = vmatprep.mubr.bf16.mxu1 %v3180_v47 }
  0x6a   :  { %3015 = vmatmul.mubr.bf16.gmra.mrb[36].mxu0 %v3149_v44  ;;  %3079 = vmatmul.mubr.bf16.gmra.mrb[36].mxu1 %v3181_v50 }
  0x6b   :  { %3018 = vmatprep.mubr.bf16.mxu0 %v3150_v45  ;;  %3082 = vmatprep.mubr.bf16.mxu1 %v3182_v51 }
  0x72   :  { %3019 = vmatmul.mubr.bf16.gmra.mrb[40].mxu0 %v3151_v48  ;;  %3083 = vmatmul.mubr.bf16.gmra.mrb[40].mxu1 %v3183_v54 }
  0x73   :  { %3022 = vmatprep.mubr.bf16.mxu0 %v3152_v49  ;;  %3086 = vmatprep.mubr.bf16.mxu1 %v3184_v55 }
  0x7a   :  { %3023 = vmatmul.mubr.bf16.gmra.mrb[44].mxu0 %v3153_v52  ;;  %3087 = vmatmul.mubr.bf16.gmra.mrb[44].mxu1 %v3185_v58 }
  0x7b   :  { %3026 = vmatprep.mubr.bf16.mxu0 %v3154_v53  ;;  %3090 = vmatprep.mubr.bf16.mxu1 %v3186_v59 }
  0x82   :  { %3027 = vmatmul.mubr.bf16.gmra.mrb[48].mxu0 %v3155_v56  ;;  %3091 = vmatmul.mubr.bf16.gmra.mrb[48].mxu1 %v3187_v62 }
  0x83   :  { %3030 = vmatprep.mubr.bf16.mxu0 %v3156_v57  ;;  %3094 = vmatprep.mubr.bf16.mxu1 %v3188_v63 }
  0x8a   :  { %3031 = vmatmul.mubr.bf16.gmra.mrb[52].mxu0 %v3157_v60  ;;  %3095 = vmatmul.mubr.bf16.gmra.mrb[52].mxu1 %v3189_v2 }
  0x8b   :  { %3034 = vmatprep.mubr.bf16.mxu0 %v3158_v61  ;;  %3098 = vmatprep.mubr.bf16.mxu1 %v3190_v3 }
  0x92   :  { %3035 = vmatmul.mubr.bf16.gmra.mrb[56].mxu0 %v3159_v0  ;;  %3099 = vmatmul.mubr.bf16.gmra.mrb[56].mxu1 %v3191_v5 }
  0x93   :  { %3038 = vmatprep.mubr.bf16.mxu0 %v3160_v1  ;;  %3102 = vmatprep.mubr.bf16.mxu1 %v3192_v6 }
  0x9a   :  { %3039 = vmatmul.mubr.bf16.gmra.mrb[60].mxu0 %v3161_v4  ;;  %3103 = vmatmul.mubr.bf16.gmra.mrb[60].mxu1 %v3193_v7 }
  0xf5   :  { %v2980_v8 = vpop.f32.mrb[0].mxu0  ;;  %v3436_v25 = vpop.f32.mrb[0].mxu1 }
  0xf6   :  { %v624_v9 = vpop.f32.mrb[1].mxu0  ;;  %v1911_v17 = vmul.f32 %v2980_v8, %v2980_v8  ;;  %v3438_v30 = vpop.f32.mrb[1].mxu1 }
  0xf7   :  { %v2981_v10 = vpop.f32.mrb[2].mxu0  ;;  %v1909_v13 = vmul.f32 %v624_v9, %v624_v9  ;;  %v3440_v33 = vpop.f32.mrb[2].mxu1 }
  0xf8   :  { %v2515_v11 = vpack.c.bf16 %v2981_v10, %v2980_v8  ;;  %v627_v12 = vpop.f32.mrb[3].mxu0  ;;  %v1912_v20 = vmul.f32 %v2981_v10, %v2981_v10  ;;  %v3442_v38 = vpop.f32.mrb[3].mxu1  ;;  %v2675_v39 = vpack.c.bf16 %v3440_v33, %v3436_v25 }
  0xf9   :  { %v2510_v14 = vpack.c.bf16 %v627_v12, %v624_v9  ;;  %v1775_v15 = vadd.f32 %v627_v12, %v624_v9  ;;  %v1910_v16 = vmul.f32 %v627_v12, %v627_v12  ;;  %v2670_v40 = vpack.c.bf16 %v3442_v38, %v3438_v30 }
  0xfa   :  { %2827 = vst [vmem:[%s4014_s2 + $0x8] sm:$0xff] %v2515_v11   ;;  %2859 = vst [vmem:[%s4014_s2 + $0x108] sm:$0xff] %v2675_v39  }
  0xfb   :  { %2511 = vst [vmem:[%s4014_s2] sm:$0xff] %v2510_v14   ;;  %v1776_v18 = vadd.f32 %v2980_v8, %v1775_v15  ;;  %v2037_v19 = vadd.f32 %v1910_v16, %v1909_v13  ;;  %2858 = vst [vmem:[%s4014_s2 + $0x100] sm:$0xff] %v2670_v40  }
  0xfd   :  { %v2038_v21 = vadd.f32 %v2037_v19, %v1911_v17  ;;  %v2984_v22 = vpop.f32.mrb[4].mxu0  ;;  %v1777_v23 = vadd.f32 %v2981_v10, %v1776_v18  ;;  %v3460_v49 = vpop.f32.mrb[4].mxu1 }
  0xfe   :  { %v640_v24 = vpop.f32.mrb[5].mxu0  ;;  %v1915_v41 = vmul.f32 %v2984_v22, %v2984_v22  ;;  %v3462_v54 = vpop.f32.mrb[5].mxu1 }
  0xff   :  { %v1778_v26 = vadd.f32 %v1777_v23, %v640_v24  ;;  %v1913_v27 = vmul.f32 %v640_v24, %v640_v24  ;;  %v2039_v28 = vadd.f32 %v2038_v21, %v1912_v20  ;;  %v2985_v29 = vpop.f32.mrb[6].mxu0  ;;  %v3464_v57 = vpop.f32.mrb[6].mxu1 }
 0x100   :  { %v2525_v31 = vpack.c.bf16 %v2985_v29, %v2984_v22  ;;  %v643_v32 = vpop.f32.mrb[7].mxu0  ;;  %v1916_v44 = vmul.f32 %v2985_v29, %v2985_v29  ;;  %v3466_v62 = vpop.f32.mrb[7].mxu1  ;;  %v2685_v63 = vpack.c.bf16 %v3464_v57, %v3460_v49 }
 0x101   :  { %v2040_v34 = vadd.f32 %v2039_v28, %v1913_v27  ;;  %v2520_v35 = vpack.c.bf16 %v643_v32, %v640_v24  ;;  %v1779_v36 = vadd.f32 %v1778_v26, %v643_v32  ;;  %v1914_v37 = vmul.f32 %v643_v32, %v643_v32 }
 0x102   :  { %2829 = vst [vmem:[%s4014_s2 + $0x18] sm:$0xff] %v2525_v31   ;;  %v2680_v0 = vpack.c.bf16 %v3466_v62, %v3462_v54  ;;  %2861 = vst [vmem:[%s4014_s2 + $0x118] sm:$0xff] %v2685_v63  }
 0x103   :  { %2828 = vst [vmem:[%s4014_s2 + $0x10] sm:$0xff] %v2520_v35   ;;  %v1780_v42 = vadd.f32 %v2984_v22, %v1779_v36  ;;  %v2041_v43 = vadd.f32 %v2040_v34, %v1914_v37 }
 0x104   :  { %2860 = vst [vmem:[%s4014_s2 + $0x110] sm:$0xff] %v2680_v0  }
 0x105   :  { %v2042_v45 = vadd.f32 %v2041_v43, %v1915_v41  ;;  %v2988_v46 = vpop.f32.mrb[8].mxu0  ;;  %v1781_v47 = vadd.f32 %v2985_v29, %v1780_v42  ;;  %v3484_v9 = vpop.f32.mrb[8].mxu1 }
 0x106   :  { %v656_v48 = vpop.f32.mrb[9].mxu0  ;;  %v1919_v1 = vmul.f32 %v2988_v46, %v2988_v46  ;;  %v3486_v14 = vpop.f32.mrb[9].mxu1 }
 0x107   :  { %v1782_v50 = vadd.f32 %v1781_v47, %v656_v48  ;;  %v1917_v51 = vmul.f32 %v656_v48, %v656_v48  ;;  %v2043_v52 = vadd.f32 %v2042_v45, %v1916_v44  ;;  %v2989_v53 = vpop.f32.mrb[10].mxu0  ;;  %v3488_v17 = vpop.f32.mrb[10].mxu1 }
 0x108   :  { %v2535_v55 = vpack.c.bf16 %v2989_v53, %v2988_v46  ;;  %v659_v56 = vpop.f32.mrb[11].mxu0  ;;  %v1920_v4 = vmul.f32 %v2989_v53, %v2989_v53  ;;  %v3490_v22 = vpop.f32.mrb[11].mxu1  ;;  %v2695_v23 = vpack.c.bf16 %v3488_v17, %v3484_v9 }
 0x109   :  { %v2044_v58 = vadd.f32 %v2043_v52, %v1917_v51  ;;  %v2530_v59 = vpack.c.bf16 %v659_v56, %v656_v48  ;;  %v1783_v60 = vadd.f32 %v1782_v50, %v659_v56  ;;  %v1918_v61 = vmul.f32 %v659_v56, %v659_v56 }
 0x10a   :  { %2831 = vst [vmem:[%s4014_s2 + $0x28] sm:$0xff] %v2535_v55   ;;  %v2690_v24 = vpack.c.bf16 %v3490_v22, %v3486_v14  ;;  %2863 = vst [vmem:[%s4014_s2 + $0x128] sm:$0xff] %v2695_v23  }
 0x10b   :  { %2830 = vst [vmem:[%s4014_s2 + $0x20] sm:$0xff] %v2530_v59   ;;  %v1784_v2 = vadd.f32 %v2988_v46, %v1783_v60  ;;  %v2045_v3 = vadd.f32 %v2044_v58, %v1918_v61 }
 0x10c   :  { %2862 = vst [vmem:[%s4014_s2 + $0x120] sm:$0xff] %v2690_v24  }
 0x10d   :  { %v2046_v5 = vadd.f32 %v2045_v3, %v1919_v1  ;;  %v2992_v6 = vpop.f32.mrb[12].mxu0  ;;  %v1785_v7 = vadd.f32 %v2989_v53, %v1784_v2  ;;  %v3508_v36 = vpop.f32.mrb[12].mxu1 }
 0x10e   :  { %v672_v8 = vpop.f32.mrb[13].mxu0  ;;  %v1923_v26 = vmul.f32 %v2992_v6, %v2992_v6  ;;  %v3510_v42 = vpop.f32.mrb[13].mxu1 }
 0x10f   :  { %v1786_v10 = vadd.f32 %v1785_v7, %v672_v8  ;;  %v1921_v11 = vmul.f32 %v672_v8, %v672_v8  ;;  %v2047_v12 = vadd.f32 %v2046_v5, %v1920_v4  ;;  %v2993_v13 = vpop.f32.mrb[14].mxu0  ;;  %v3512_v45 = vpop.f32.mrb[14].mxu1 }
 0x110   :  { %v2545_v15 = vpack.c.bf16 %v2993_v13, %v2992_v6  ;;  %v675_v16 = vpop.f32.mrb[15].mxu0  ;;  %v1924_v29 = vmul.f32 %v2993_v13, %v2993_v13  ;;  %v3514_v51 = vpop.f32.mrb[15].mxu1  ;;  %v2705_v52 = vpack.c.bf16 %v3512_v45, %v3508_v36 }
 0x111   :  { %v2048_v18 = vadd.f32 %v2047_v12, %v1921_v11  ;;  %v2540_v19 = vpack.c.bf16 %v675_v16, %v672_v8  ;;  %v1787_v20 = vadd.f32 %v1786_v10, %v675_v16  ;;  %v1922_v21 = vmul.f32 %v675_v16, %v675_v16 }
 0x112   :  { %2833 = vst [vmem:[%s4014_s2 + $0x38] sm:$0xff] %v2545_v15   ;;  %v2700_v53 = vpack.c.bf16 %v3514_v51, %v3510_v42  ;;  %2865 = vst [vmem:[%s4014_s2 + $0x138] sm:$0xff] %v2705_v52  }
 0x113   :  { %2832 = vst [vmem:[%s4014_s2 + $0x30] sm:$0xff] %v2540_v19   ;;  %v1788_v27 = vadd.f32 %v2992_v6, %v1787_v20  ;;  %v2049_v28 = vadd.f32 %v2048_v18, %v1922_v21 }
 0x114   :  { %2864 = vst [vmem:[%s4014_s2 + $0x130] sm:$0xff] %v2700_v53  }
 0x115   :  { %v2050_v31 = vadd.f32 %v2049_v28, %v1923_v26  ;;  %v2996_v32 = vpop.f32.mrb[16].mxu0  ;;  %v1789_v34 = vadd.f32 %v2993_v13, %v1788_v27  ;;  %v3532_v1 = vpop.f32.mrb[16].mxu1 }
 0x116   :  { %v688_v35 = vpop.f32.mrb[17].mxu0  ;;  %v1927_v55 = vmul.f32 %v2996_v32, %v2996_v32  ;;  %v3534_v6 = vpop.f32.mrb[17].mxu1 }
 0x117   :  { %v1790_v37 = vadd.f32 %v1789_v34, %v688_v35  ;;  %v1925_v39 = vmul.f32 %v688_v35, %v688_v35  ;;  %v2051_v40 = vadd.f32 %v2050_v31, %v1924_v29  ;;  %v2997_v41 = vpop.f32.mrb[18].mxu0  ;;  %v3536_v10 = vpop.f32.mrb[18].mxu1 }
 0x118   :  { %v2555_v43 = vpack.c.bf16 %v2997_v41, %v2996_v32  ;;  %v691_v44 = vpop.f32.mrb[19].mxu0  ;;  %v1928_v59 = vmul.f32 %v2997_v41, %v2997_v41  ;;  %v3538_v16 = vpop.f32.mrb[19].mxu1  ;;  %v2715_v18 = vpack.c.bf16 %v3536_v10, %v3532_v1 }
 0x119   :  { %v2052_v46 = vadd.f32 %v2051_v40, %v1925_v39  ;;  %v2550_v47 = vpack.c.bf16 %v691_v44, %v688_v35  ;;  %v1791_v48 = vadd.f32 %v1790_v37, %v691_v44  ;;  %v1926_v50 = vmul.f32 %v691_v44, %v691_v44 }
 0x11a   :  { %2835 = vst [vmem:[%s4014_s2 + $0x48] sm:$0xff] %v2555_v43   ;;  %v2710_v19 = vpack.c.bf16 %v3538_v16, %v3534_v6  ;;  %2867 = vst [vmem:[%s4014_s2 + $0x148] sm:$0xff] %v2715_v18  }
 0x11b   :  { %2834 = vst [vmem:[%s4014_s2 + $0x40] sm:$0xff] %v2550_v47   ;;  %v1792_v56 = vadd.f32 %v2996_v32, %v1791_v48  ;;  %v2053_v58 = vadd.f32 %v2052_v46, %v1926_v50 }
 0x11c   :  { %2866 = vst [vmem:[%s4014_s2 + $0x140] sm:$0xff] %v2710_v19  }
 0x11d   :  { %v2054_v60 = vadd.f32 %v2053_v58, %v1927_v55  ;;  %v3000_v61 = vpop.f32.mrb[20].mxu0  ;;  %v1793_v63 = vadd.f32 %v2997_v41, %v1792_v56  ;;  %v3556_v31 = vpop.f32.mrb[20].mxu1 }
 0x11e   :  { %v704_v0 = vpop.f32.mrb[21].mxu0  ;;  %v1931_v20 = vmul.f32 %v3000_v61, %v3000_v61  ;;  %v3558_v39 = vpop.f32.mrb[21].mxu1 }
 0x11f   :  { %v1794_v2 = vadd.f32 %v1793_v63, %v704_v0  ;;  %v1929_v3 = vmul.f32 %v704_v0, %v704_v0  ;;  %v2055_v4 = vadd.f32 %v2054_v60, %v1928_v59  ;;  %v3001_v5 = vpop.f32.mrb[22].mxu0  ;;  %v3560_v43 = vpop.f32.mrb[22].mxu1 }
 0x120   :  { %v2565_v7 = vpack.c.bf16 %v3001_v5, %v3000_v61  ;;  %v707_v8 = vpop.f32.mrb[23].mxu0  ;;  %v1932_v24 = vmul.f32 %v3001_v5, %v3001_v5  ;;  %v3562_v50 = vpop.f32.mrb[23].mxu1  ;;  %v2725_v52 = vpack.c.bf16 %v3560_v43, %v3556_v31 }
 0x121   :  { %v2056_v11 = vadd.f32 %v2055_v4, %v1929_v3  ;;  %v2560_v12 = vpack.c.bf16 %v707_v8, %v704_v0  ;;  %v1795_v13 = vadd.f32 %v1794_v2, %v707_v8  ;;  %v1930_v15 = vmul.f32 %v707_v8, %v707_v8 }
 0x122   :  { %2837 = vst [vmem:[%s4014_s2 + $0x58] sm:$0xff] %v2565_v7   ;;  %v2720_v53 = vpack.c.bf16 %v3562_v50, %v3558_v39  ;;  %2869 = vst [vmem:[%s4014_s2 + $0x158] sm:$0xff] %v2725_v52  }
 0x123   :  { %2836 = vst [vmem:[%s4014_s2 + $0x50] sm:$0xff] %v2560_v12   ;;  %v1796_v21 = vadd.f32 %v3000_v61, %v1795_v13  ;;  %v2057_v23 = vadd.f32 %v2056_v11, %v1930_v15 }
 0x124   :  { %2868 = vst [vmem:[%s4014_s2 + $0x150] sm:$0xff] %v2720_v53  }
 0x125   :  { %v2058_v26 = vadd.f32 %v2057_v23, %v1931_v20  ;;  %v3004_v27 = vpop.f32.mrb[24].mxu0  ;;  %v1797_v28 = vadd.f32 %v3001_v5, %v1796_v21  ;;  %v3580_v2 = vpop.f32.mrb[24].mxu1 }
 0x126   :  { %v720_v29 = vpop.f32.mrb[25].mxu0  ;;  %v1935_v55 = vmul.f32 %v3004_v27, %v3004_v27  ;;  %v3582_v8 = vpop.f32.mrb[25].mxu1 }
 0x127   :  { %v1798_v32 = vadd.f32 %v1797_v28, %v720_v29  ;;  %v1933_v34 = vmul.f32 %v720_v29, %v720_v29  ;;  %v2059_v35 = vadd.f32 %v2058_v26, %v1932_v24  ;;  %v3005_v37 = vpop.f32.mrb[26].mxu0  ;;  %v3584_v13 = vpop.f32.mrb[26].mxu1 }
 0x128   :  { %v2575_v40 = vpack.c.bf16 %v3005_v37, %v3004_v27  ;;  %v723_v41 = vpop.f32.mrb[27].mxu0  ;;  %v1936_v59 = vmul.f32 %v3005_v37, %v3005_v37  ;;  %v3586_v21 = vpop.f32.mrb[27].mxu1  ;;  %v2735_v23 = vpack.c.bf16 %v3584_v13, %v3580_v2 }
 0x129   :  { %v2060_v44 = vadd.f32 %v2059_v35, %v1933_v34  ;;  %v2570_v46 = vpack.c.bf16 %v723_v41, %v720_v29  ;;  %v1799_v47 = vadd.f32 %v1798_v32, %v723_v41  ;;  %v1934_v48 = vmul.f32 %v723_v41, %v723_v41 }
 0x12a   :  { %2839 = vst [vmem:[%s4014_s2 + $0x68] sm:$0xff] %v2575_v40   ;;  %v2730_v24 = vpack.c.bf16 %v3586_v21, %v3582_v8  ;;  %2871 = vst [vmem:[%s4014_s2 + $0x168] sm:$0xff] %v2735_v23  }
 0x12b   :  { %2838 = vst [vmem:[%s4014_s2 + $0x60] sm:$0xff] %v2570_v46   ;;  %v1800_v56 = vadd.f32 %v3004_v27, %v1799_v47  ;;  %v2061_v58 = vadd.f32 %v2060_v44, %v1934_v48 }
 0x12c   :  { %2870 = vst [vmem:[%s4014_s2 + $0x160] sm:$0xff] %v2730_v24  }
 0x12d   :  { %v2062_v60 = vadd.f32 %v2061_v58, %v1935_v55  ;;  %v3008_v61 = vpop.f32.mrb[28].mxu0  ;;  %v1801_v63 = vadd.f32 %v3005_v37, %v1800_v56  ;;  %v3604_v40 = vpop.f32.mrb[28].mxu1 }
 0x12e   :  { %v736_v0 = vpop.f32.mrb[29].mxu0  ;;  %v1939_v26 = vmul.f32 %v3008_v61, %v3008_v61  ;;  %v3606_v48 = vpop.f32.mrb[29].mxu1 }
 0x12f   :  { %v1802_v3 = vadd.f32 %v1801_v63, %v736_v0  ;;  %v1937_v4 = vmul.f32 %v736_v0, %v736_v0  ;;  %v2063_v5 = vadd.f32 %v2062_v60, %v1936_v59  ;;  %v3009_v7 = vpop.f32.mrb[30].mxu0  ;;  %v3608_v55 = vpop.f32.mrb[30].mxu1 }
 0x130   :  { %v2585_v11 = vpack.c.bf16 %v3009_v7, %v3008_v61  ;;  %v739_v12 = vpop.f32.mrb[31].mxu0  ;;  %v1940_v29 = vmul.f32 %v3009_v7, %v3009_v7  ;;  %v2745_v63 = vpack.c.bf16 %v3608_v55, %v3604_v40 }
 0x131   :  { %v2064_v15 = vadd.f32 %v2063_v5, %v1937_v4  ;;  %v2580_v18 = vpack.c.bf16 %v739_v12, %v736_v0  ;;  %v1803_v19 = vadd.f32 %v1802_v3, %v739_v12  ;;  %v1938_v20 = vmul.f32 %v739_v12, %v739_v12 }
 0x132   :  { %2841 = vst [vmem:[%s4014_s2 + $0x78] sm:$0xff] %v2585_v11   ;;  %2873 = vst [vmem:[%s4014_s2 + $0x178] sm:$0xff] %v2745_v63  }
 0x133   :  { %2840 = vst [vmem:[%s4014_s2 + $0x70] sm:$0xff] %v2580_v18   ;;  %v1804_v27 = vadd.f32 %v3008_v61, %v1803_v19  ;;  %v2065_v28 = vadd.f32 %v2064_v15, %v1938_v20  ;;  %v3610_v61 = vpop.f32.mrb[31].mxu1 }
 0x134   :  { %v2740_v0 = vpack.c.bf16 %v3610_v61, %v3606_v48 }
 0x135   :  { %v2066_v32 = vadd.f32 %v2065_v28, %v1939_v26  ;;  %v3012_v34 = vpop.f32.mrb[32].mxu0  ;;  %v1805_v35 = vadd.f32 %v3009_v7, %v1804_v27  ;;  %v3628_v19 = vpop.f32.mrb[32].mxu1 }
 0x136   :  { %v752_v37 = vpop.f32.mrb[33].mxu0  ;;  %v1943_v3 = vmul.f32 %v3012_v34, %v3012_v34  ;;  %2872 = vst [vmem:[%s4014_s2 + $0x170] sm:$0xff] %v2740_v0   ;;  %v3630_v27 = vpop.f32.mrb[33].mxu1 }
 0x137   :  { %v1806_v41 = vadd.f32 %v1805_v35, %v752_v37  ;;  %v1941_v44 = vmul.f32 %v752_v37, %v752_v37  ;;  %v2067_v46 = vadd.f32 %v2066_v32, %v1940_v29  ;;  %v3013_v47 = vpop.f32.mrb[34].mxu0  ;;  %v3632_v32 = vpop.f32.mrb[34].mxu1 }
 0x138   :  { %v2595_v52 = vpack.c.bf16 %v3013_v47, %v3012_v34  ;;  %v755_v53 = vpop.f32.mrb[35].mxu0  ;;  %v1944_v7 = vmul.f32 %v3013_v47, %v3013_v47 }
 0x139   :  { %v2068_v56 = vadd.f32 %v2067_v46, %v1941_v44  ;;  %v2590_v58 = vpack.c.bf16 %v755_v53, %v752_v37  ;;  %v1807_v59 = vadd.f32 %v1806_v41, %v755_v53  ;;  %v1942_v60 = vmul.f32 %v755_v53, %v755_v53  ;;  %v3634_v44 = vpop.f32.mrb[35].mxu1 }
 0x13a   :  { %2843 = vst [vmem:[%s4014_s2 + $0x88] sm:$0xff] %v2595_v52   ;;  %v2755_v46 = vpack.c.bf16 %v3632_v32, %v3628_v19 }
 0x13b   :  { %2842 = vst [vmem:[%s4014_s2 + $0x80] sm:$0xff] %v2590_v58   ;;  %v1808_v4 = vadd.f32 %v3012_v34, %v1807_v59  ;;  %v2069_v5 = vadd.f32 %v2068_v56, %v1942_v60 }
 0x13c   :  { %2875 = vst [vmem:[%s4014_s2 + $0x188] sm:$0xff] %v2755_v46  }
 0x13d   :  { %v2070_v11 = vadd.f32 %v2069_v5, %v1943_v3  ;;  %v3016_v12 = vpop.f32.mrb[36].mxu0  ;;  %v1809_v15 = vadd.f32 %v3013_v47, %v1808_v4  ;;  %v2750_v47 = vpack.c.bf16 %v3634_v44, %v3630_v27  ;;  %v3652_v3 = vpop.f32.mrb[36].mxu1 }
 0x13e   :  { %v768_v18 = vpop.f32.mrb[37].mxu0  ;;  %v1947_v52 = vmul.f32 %v3016_v12, %v3016_v12 }
 0x13f   :  { %v1810_v20 = vadd.f32 %v1809_v15, %v768_v18  ;;  %v1945_v23 = vmul.f32 %v768_v18, %v768_v18  ;;  %v2071_v24 = vadd.f32 %v2070_v11, %v1944_v7  ;;  %v3017_v26 = vpop.f32.mrb[38].mxu0  ;;  %2874 = vst [vmem:[%s4014_s2 + $0x180] sm:$0xff] %v2750_v47  }
 0x140   :  { %v2605_v28 = vpack.c.bf16 %v3017_v26, %v3016_v12  ;;  %v771_v29 = vpop.f32.mrb[39].mxu0  ;;  %v1948_v58 = vmul.f32 %v3017_v26, %v3017_v26 }
 0x141   :  { %v2072_v34 = vadd.f32 %v2071_v24, %v1945_v23  ;;  %v2600_v35 = vpack.c.bf16 %v771_v29, %v768_v18  ;;  %v1811_v37 = vadd.f32 %v1810_v20, %v771_v29  ;;  %v1946_v41 = vmul.f32 %v771_v29, %v771_v29 }
 0x142   :  { %2845 = vst [vmem:[%s4014_s2 + $0x98] sm:$0xff] %v2605_v28  }
 0x143   :  { %2844 = vst [vmem:[%s4014_s2 + $0x90] sm:$0xff] %v2600_v35   ;;  %v1812_v53 = vadd.f32 %v3016_v12, %v1811_v37  ;;  %v2073_v56 = vadd.f32 %v2072_v34, %v1946_v41  ;;  %v3654_v12 = vpop.f32.mrb[37].mxu1 }
 0x144   :  { %v3656_v20 = vpop.f32.mrb[38].mxu1 }
 0x145   :  { %v2074_v59 = vadd.f32 %v2073_v56, %v1947_v52  ;;  %v3020_v60 = vpop.f32.mrb[40].mxu0  ;;  %v1813_v63 = vadd.f32 %v3017_v26, %v1812_v53  ;;  %v3658_v34 = vpop.f32.mrb[39].mxu1  ;;  %v2765_v26 = vpack.c.bf16 %v3656_v20, %v3652_v3 }
 0x146   :  { %v784_v0 = vpop.f32.mrb[41].mxu0  ;;  %v2760_v35 = vpack.c.bf16 %v3658_v34, %v3654_v12  ;;  %v1951_v37 = vmul.f32 %v3020_v60, %v3020_v60 }
 0x147   :  { %v1814_v4 = vadd.f32 %v1813_v63, %v784_v0  ;;  %v1949_v5 = vmul.f32 %v784_v0, %v784_v0  ;;  %v2075_v7 = vadd.f32 %v2074_v59, %v1948_v58  ;;  %v3021_v11 = vpop.f32.mrb[42].mxu0  ;;  %2877 = vst [vmem:[%s4014_s2 + $0x198] sm:$0xff] %v2765_v26   ;;  %v3676_v59 = vpop.f32.mrb[40].mxu1 }
 0x148   :  { %v2615_v15 = vpack.c.bf16 %v3021_v11, %v3020_v60  ;;  %v787_v18 = vpop.f32.mrb[43].mxu0  ;;  %2876 = vst [vmem:[%s4014_s2 + $0x190] sm:$0xff] %v2760_v35   ;;  %v1952_v47 = vmul.f32 %v3021_v11, %v3021_v11  ;;  %4044 = vst [vmem:[#allocation2_spill] sm:$0xff] %v3676_v59 }
 0x149   :  { %v2076_v23 = vadd.f32 %v2075_v7, %v1949_v5  ;;  %v2610_v24 = vpack.c.bf16 %v787_v18, %v784_v0  ;;  %v1815_v28 = vadd.f32 %v1814_v4, %v787_v18  ;;  %v1950_v29 = vmul.f32 %v787_v18, %v787_v18  ;;  %v3678_v5 = vpop.f32.mrb[41].mxu1 }
 0x14a   :  { %2847 = vst [vmem:[%s4014_s2 + $0xa8] sm:$0xff] %v2615_v15   ;;  %v3680_v18 = vpop.f32.mrb[42].mxu1 }
 0x14b   :  { %2846 = vst [vmem:[%s4014_s2 + $0xa0] sm:$0xff] %v2610_v24   ;;  %v1816_v41 = vadd.f32 %v3020_v60, %v1815_v28  ;;  %v2077_v46 = vadd.f32 %v2076_v23, %v1950_v29  ;;  %4045 = vst [vmem:[#allocation3_spill] sm:$0xff] %v3680_v18  ;;  %v3682_v26 = vpop.f32.mrb[43].mxu1 }
 0x14c   :  { %v2770_v35 = vpack.c.bf16 %v3682_v26, %v3678_v5 }
 0x14d   :  { %v2078_v52 = vadd.f32 %v2077_v46, %v1951_v37  ;;  %v3024_v53 = vpop.f32.mrb[44].mxu0  ;;  %v1817_v56 = vadd.f32 %v3021_v11, %v1816_v41  ;;  %v2775_v11 = vpack.c.bf16 %v3680_v18, %v3676_v59 }
 0x14e   :  { %v800_v58 = vpop.f32.mrb[45].mxu0  ;;  %v1955_v37 = vmul.f32 %v3024_v53, %v3024_v53  ;;  %2878 = vst [vmem:[%s4014_s2 + $0x1a0] sm:$0xff] %v2770_v35  }
 0x14f   :  { %v1818_v63 = vadd.f32 %v1817_v56, %v800_v58  ;;  %v1953_v0 = vmul.f32 %v800_v58, %v800_v58  ;;  %v2079_v4 = vadd.f32 %v2078_v52, %v1952_v47  ;;  %v3025_v60 = vpop.f32.mrb[46].mxu0  ;;  %2879 = vst [vmem:[%s4014_s2 + $0x1a8] sm:$0xff] %v2775_v11  }
 0x150   :  { %v2625_v7 = vpack.c.bf16 %v3025_v60, %v3024_v53  ;;  %v803_v15 = vpop.f32.mrb[47].mxu0  ;;  %v1956_v47 = vmul.f32 %v3025_v60, %v3025_v60 }
 0x151   :  { %v2080_v23 = vadd.f32 %v2079_v4, %v1953_v0  ;;  %v2620_v24 = vpack.c.bf16 %v803_v15, %v800_v58  ;;  %v1819_v28 = vadd.f32 %v1818_v63, %v803_v15  ;;  %v1954_v29 = vmul.f32 %v803_v15, %v803_v15  ;;  %v3700_v0 = vpop.f32.mrb[44].mxu1 }
 0x152   :  { %2849 = vst [vmem:[%s4014_s2 + $0xb8] sm:$0xff] %v2625_v7   ;;  %4046 = vst [vmem:[#allocation4_spill] sm:$0xff] %v3700_v0 }
 0x153   :  { %2848 = vst [vmem:[%s4014_s2 + $0xb0] sm:$0xff] %v2620_v24   ;;  %v1820_v41 = vadd.f32 %v3024_v53, %v1819_v28  ;;  %v2081_v46 = vadd.f32 %v2080_v23, %v1954_v29  ;;  %v3702_v23 = vpop.f32.mrb[45].mxu1 }
 0x154   :  { %4047 = vst [vmem:[#allocation5_spill] sm:$0xff] %v3702_v23  ;;  %v3704_v29 = vpop.f32.mrb[46].mxu1 }
 0x155   :  { %v2082_v52 = vadd.f32 %v2081_v46, %v1955_v37  ;;  %v3028_v56 = vpop.f32.mrb[48].mxu0  ;;  %v1821_v58 = vadd.f32 %v3025_v60, %v1820_v41  ;;  %4048 = vst [vmem:[#allocation6_spill] sm:$0xff] %v3704_v29  ;;  %v3706_v37 = vpop.f32.mrb[47].mxu1  ;;  %v2785_v60 = vpack.c.bf16 %v3704_v29, %v3700_v0 }
 0x156   :  { %v816_v63 = vpop.f32.mrb[49].mxu0  ;;  %4049 = vst [vmem:[#allocation7_spill] sm:$0xff] %v3706_v37  ;;  %v2780_v41 = vpack.c.bf16 %v3706_v37, %v3702_v23  ;;  %v1959_v46 = vmul.f32 %v3028_v56, %v3028_v56 }
 0x157   :  { %v1822_v4 = vadd.f32 %v1821_v58, %v816_v63  ;;  %v1957_v7 = vmul.f32 %v816_v63, %v816_v63  ;;  %v2083_v15 = vadd.f32 %v2082_v52, %v1956_v47  ;;  %v3029_v53 = vpop.f32.mrb[50].mxu0  ;;  %2881 = vst [vmem:[%s4014_s2 + $0x1b8] sm:$0xff] %v2785_v60  }
 0x158   :  { %v2635_v24 = vpack.c.bf16 %v3029_v53, %v3028_v56  ;;  %v819_v28 = vpop.f32.mrb[51].mxu0  ;;  %2880 = vst [vmem:[%s4014_s2 + $0x1b0] sm:$0xff] %v2780_v41   ;;  %v1960_v58 = vmul.f32 %v3029_v53, %v3029_v53 }
 0x159   :  { %v2084_v11 = vadd.f32 %v2083_v15, %v1957_v7  ;;  %v2630_v18 = vpack.c.bf16 %v819_v28, %v816_v63  ;;  %v1823_v35 = vadd.f32 %v1822_v4, %v819_v28  ;;  %v1958_v59 = vmul.f32 %v819_v28, %v819_v28 }
 0x15a   :  { %2851 = vst [vmem:[%s4014_s2 + $0xc8] sm:$0xff] %v2635_v24   ;;  %v3724_v24 = vpop.f32.mrb[48].mxu1 }
 0x15b   :  { %2850 = vst [vmem:[%s4014_s2 + $0xc0] sm:$0xff] %v2630_v18   ;;  %v1824_v47 = vadd.f32 %v3028_v56, %v1823_v35  ;;  %v2085_v52 = vadd.f32 %v2084_v11, %v1958_v59  ;;  %4050 = vst [vmem:[#allocation8_spill] sm:$0xff] %v3724_v24  ;;  %v3726_v59 = vpop.f32.mrb[49].mxu1 }
 0x15c   :  { %4051 = vst [vmem:[#allocation9_spill] sm:$0xff] %v3726_v59  ;;  %v3728_v60 = vpop.f32.mrb[50].mxu1 }
 0x15d   :  { %v2086_v63 = vadd.f32 %v2085_v52, %v1959_v46  ;;  %v3032_v4 = vpop.f32.mrb[52].mxu0  ;;  %v1825_v7 = vadd.f32 %v3029_v53, %v1824_v47  ;;  %4052 = vst [vmem:[#allocation10_spill] sm:$0xff] %v3728_v60  ;;  %v3730_v46 = vpop.f32.mrb[51].mxu1  ;;  %v2795_v53 = vpack.c.bf16 %v3728_v60, %v3724_v24 }
 0x15e   :  { %v832_v15 = vpop.f32.mrb[53].mxu0  ;;  %4053 = vst [vmem:[#allocation11_spill] sm:$0xff] %v3730_v46  ;;  %v2790_v47 = vpack.c.bf16 %v3730_v46, %v3726_v59  ;;  %v1963_v52 = vmul.f32 %v3032_v4, %v3032_v4 }
 0x15f   :  { %v1826_v28 = vadd.f32 %v1825_v7, %v832_v15  ;;  %v1961_v29 = vmul.f32 %v832_v15, %v832_v15  ;;  %v2087_v18 = vadd.f32 %v2086_v63, %v1960_v58  ;;  %v3033_v56 = vpop.f32.mrb[54].mxu0  ;;  %2883 = vst [vmem:[%s4014_s2 + $0x1c8] sm:$0xff] %v2795_v53  }
 0x160   :  { %v2645_v11 = vpack.c.bf16 %v3033_v56, %v3032_v4  ;;  %v835_v35 = vpop.f32.mrb[55].mxu0  ;;  %2882 = vst [vmem:[%s4014_s2 + $0x1c0] sm:$0xff] %v2790_v47   ;;  %v1964_v63 = vmul.f32 %v3033_v56, %v3033_v56 }
 0x161   :  { %v2088_v0 = vadd.f32 %v2087_v18, %v1961_v29  ;;  %v2640_v37 = vpack.c.bf16 %v835_v35, %v832_v15  ;;  %v1827_v41 = vadd.f32 %v1826_v28, %v835_v35  ;;  %v1962_v23 = vmul.f32 %v835_v35, %v835_v35 }
 0x162   :  { %2853 = vst [vmem:[%s4014_s2 + $0xd8] sm:$0xff] %v2645_v11   ;;  %v3748_v11 = vpop.f32.mrb[52].mxu1 }
 0x163   :  { %2852 = vst [vmem:[%s4014_s2 + $0xd0] sm:$0xff] %v2640_v37   ;;  %v1828_v29 = vadd.f32 %v3032_v4, %v1827_v41  ;;  %v2089_v58 = vadd.f32 %v2088_v0, %v1962_v23  ;;  %4054 = vst [vmem:[#allocation12_spill] sm:$0xff] %v3748_v11  ;;  %v3750_v0 = vpop.f32.mrb[53].mxu1 }
 0x164   :  { %4055 = vst [vmem:[#allocation13_spill] sm:$0xff] %v3750_v0  ;;  %v3752_v53 = vpop.f32.mrb[54].mxu1 }
 0x165   :  { %v2090_v7 = vadd.f32 %v2089_v58, %v1963_v52  ;;  %v3036_v15 = vpop.f32.mrb[56].mxu0  ;;  %v1829_v28 = vadd.f32 %v3033_v56, %v1828_v29  ;;  %4056 = vst [vmem:[#allocation14_spill] sm:$0xff] %v3752_v53  ;;  %v3754_v52 = vpop.f32.mrb[55].mxu1  ;;  %v2805_v56 = vpack.c.bf16 %v3752_v53, %v3748_v11 }
 0x166   :  { %v848_v18 = vpop.f32.mrb[57].mxu0  ;;  %4057 = vst [vmem:[#allocation15_spill] sm:$0xff] %v3754_v52  ;;  %v2800_v29 = vpack.c.bf16 %v3754_v52, %v3750_v0  ;;  %v1967_v58 = vmul.f32 %v3036_v15, %v3036_v15 }
 0x167   :  { %v1830_v35 = vadd.f32 %v1829_v28, %v848_v18  ;;  %v1965_v60 = vmul.f32 %v848_v18, %v848_v18  ;;  %v2091_v37 = vadd.f32 %v2090_v7, %v1964_v63  ;;  %v3037_v4 = vpop.f32.mrb[58].mxu0  ;;  %2885 = vst [vmem:[%s4014_s2 + $0x1d8] sm:$0xff] %v2805_v56  }
 0x168   :  { %v2655_v23 = vpack.c.bf16 %v3037_v4, %v3036_v15  ;;  %v851_v41 = vpop.f32.mrb[59].mxu0  ;;  %2884 = vst [vmem:[%s4014_s2 + $0x1d0] sm:$0xff] %v2800_v29   ;;  %v1968_v7 = vmul.f32 %v3037_v4, %v3037_v4 }
 0x169   :  { %v2092_v24 = vadd.f32 %v2091_v37, %v1965_v60  ;;  %v2650_v46 = vpack.c.bf16 %v851_v41, %v848_v18  ;;  %v1831_v47 = vadd.f32 %v1830_v35, %v851_v41  ;;  %v1966_v59 = vmul.f32 %v851_v41, %v851_v41 }
 0x16a   :  { %2855 = vst [vmem:[%s4014_s2 + $0xe8] sm:$0xff] %v2655_v23   ;;  %v3772_v23 = vpop.f32.mrb[56].mxu1 }
 0x16b   :  { %2854 = vst [vmem:[%s4014_s2 + $0xe0] sm:$0xff] %v2650_v46   ;;  %v1832_v60 = vadd.f32 %v3036_v15, %v1831_v47  ;;  %v2093_v63 = vadd.f32 %v2092_v24, %v1966_v59  ;;  %v3774_v24 = vpop.f32.mrb[57].mxu1 }
 0x16c   :  { %v3776_v56 = vpop.f32.mrb[58].mxu1 }
 0x16d   :  { %v2094_v28 = vadd.f32 %v2093_v63, %v1967_v58  ;;  %v3040_v18 = vpop.f32.mrb[60].mxu0  ;;  %v1833_v35 = vadd.f32 %v3037_v4, %v1832_v60  ;;  %v3778_v58 = vpop.f32.mrb[59].mxu1  ;;  %v2815_v4 = vpack.c.bf16 %v3776_v56, %v3772_v23 }
 0x16e   :  { %v864_v37 = vpop.f32.mrb[61].mxu0  ;;  %v2810_v60 = vpack.c.bf16 %v3778_v58, %v3774_v24  ;;  %v1971_v63 = vmul.f32 %v3040_v18, %v3040_v18 }
 0x16f   :  { %v1834_v41 = vadd.f32 %v1833_v35, %v864_v37  ;;  %v1969_v53 = vmul.f32 %v864_v37, %v864_v37  ;;  %v2095_v46 = vadd.f32 %v2094_v28, %v1968_v7  ;;  %v3041_v15 = vpop.f32.mrb[62].mxu0  ;;  %2887 = vst [vmem:[%s4014_s2 + $0x1e8] sm:$0xff] %v2815_v4  }
 0x170   :  { %v2665_v59 = vpack.c.bf16 %v3041_v15, %v3040_v18  ;;  %v867_v47 = vpop.f32.mrb[63].mxu0  ;;  %2886 = vst [vmem:[%s4014_s2 + $0x1e0] sm:$0xff] %v2810_v60   ;;  %v1972_v28 = vmul.f32 %v3041_v15, %v3041_v15 }
 0x171   :  { %v2096_v11 = vadd.f32 %v2095_v46, %v1969_v53  ;;  %v2660_v52 = vpack.c.bf16 %v867_v47, %v864_v37  ;;  %v1835_v29 = vadd.f32 %v1834_v41, %v867_v47  ;;  %v1970_v0 = vmul.f32 %v867_v47, %v867_v47  ;;  %v3798_v46 = vpop.f32.mrb[60].mxu1 }
 0x172   :  { %2857 = vst [vmem:[%s4014_s2 + $0xf8] sm:$0xff] %v2665_v59   ;;  %v1973_v41 = vmul.f32 %v3438_v30, %v3438_v30 }
 0x173   :  { %2856 = vst [vmem:[%s4014_s2 + $0xf0] sm:$0xff] %v2660_v52   ;;  %v1836_v53 = vadd.f32 %v3040_v18, %v1835_v29  ;;  %v2097_v7 = vadd.f32 %v2096_v11, %v1970_v0  ;;  %v3801_v11 = vpop.f32.mrb[61].mxu1  ;;  %v1974_v29 = vmul.f32 %v3442_v38, %v3442_v38 }
 0x174   :  { %v3803_v0 = vpop.f32.mrb[62].mxu1 }
 0x175   :  { %v1837_v35 = vadd.f32 %v3041_v15, %v1836_v53  ;;  %v2098_v37 = vadd.f32 %v2097_v7, %v1971_v63  ;;  %v2825_v15 = vpack.c.bf16 %v3803_v0, %v3798_v46  ;;  %v3810_v4 = vpop.f32.mrb[63].mxu1 }
 0x176   :  { %v2820_v60 = vpack.c.bf16 %v3810_v4, %v3801_v11 }
 0x177   :  { %v2099_v59 = vadd.f32 %v2098_v37, %v1972_v28  ;;  %v1838_v52 = vadd.f32 %v1837_v35, %v3438_v30  ;;  %v1975_v30 = vmul.f32 %v3436_v25, %v3436_v25  ;;  %2889 = vst [vmem:[%s4014_s2 + $0x1f8] sm:$0xff] %v2825_v15   ;;  %v1977_v35 = vmul.f32 %v3462_v54, %v3462_v54 }
 0x178   :  { %2888 = vst [vmem:[%s4014_s2 + $0x1f0] sm:$0xff] %v2820_v60  }
 0x179   :  { %v2100_v18 = vadd.f32 %v2099_v59, %v1973_v41  ;;  %v1839_v47 = vadd.f32 %v1838_v52, %v3442_v38  ;;  %v1976_v38 = vmul.f32 %v3440_v33, %v3440_v33  ;;  %v1978_v52 = vmul.f32 %v3466_v62, %v3466_v62 }
 0x17b   :  { %v1840_v63 = vadd.f32 %v3436_v25, %v1839_v47  ;;  %v2101_v53 = vadd.f32 %v2100_v18, %v1974_v29  ;;  %v1979_v18 = vmul.f32 %v3460_v49, %v3460_v49 }
 0x17d   :  { %v2102_v7 = vadd.f32 %v2101_v53, %v1975_v30  ;;  %v1841_v28 = vadd.f32 %v3440_v33, %v1840_v63  ;;  %v1980_v33 = vmul.f32 %v3464_v57, %v3464_v57 }
 0x17f   :  { %v1842_v25 = vadd.f32 %v1841_v28, %v3462_v54  ;;  %v2103_v37 = vadd.f32 %v2102_v7, %v1976_v38  ;;  %v1981_v54 = vmul.f32 %v3486_v14, %v3486_v14  ;;  %v1982_v38 = vmul.f32 %v3490_v22, %v3490_v22 }
 0x181   :  { %v2104_v41 = vadd.f32 %v2103_v37, %v1977_v35  ;;  %v1843_v59 = vadd.f32 %v1842_v25, %v3466_v62 }
 0x183   :  { %v1844_v47 = vadd.f32 %v3460_v49, %v1843_v59  ;;  %v2105_v29 = vadd.f32 %v2104_v41, %v1978_v52  ;;  %v1983_v49 = vmul.f32 %v3484_v9, %v3484_v9  ;;  %v1986_v52 = vmul.f32 %v3514_v51, %v3514_v51 }
 0x185   :  { %v2106_v15 = vadd.f32 %v2105_v29, %v1979_v18  ;;  %v1845_v60 = vadd.f32 %v3464_v57, %v1844_v47  ;;  %v1984_v57 = vmul.f32 %v3488_v17, %v3488_v17 }
 0x187   :  { %v1846_v30 = vadd.f32 %v1845_v60, %v3486_v14  ;;  %v2107_v63 = vadd.f32 %v2106_v15, %v1980_v33  ;;  %v1985_v14 = vmul.f32 %v3510_v42, %v3510_v42 }
 0x189   :  { %v2108_v53 = vadd.f32 %v2107_v63, %v1981_v54  ;;  %v1847_v62 = vadd.f32 %v1846_v30, %v3490_v22  ;;  %v1990_v30 = vmul.f32 %v3538_v16, %v3538_v16 }
 0x18b   :  { %v1848_v7 = vadd.f32 %v3484_v9, %v1847_v62  ;;  %v2109_v28 = vadd.f32 %v2108_v53, %v1982_v38  ;;  %v1987_v9 = vmul.f32 %v3508_v36, %v3508_v36 }
 0x18d   :  { %v2110_v35 = vadd.f32 %v2109_v28, %v1983_v49  ;;  %v1849_v25 = vadd.f32 %v3488_v17, %v1848_v7  ;;  %v1988_v17 = vmul.f32 %v3512_v45, %v3512_v45 }
 0x18f   :  { %v1850_v37 = vadd.f32 %v1849_v25, %v3510_v42  ;;  %v2111_v41 = vadd.f32 %v2110_v35, %v1984_v57  ;;  %v1989_v42 = vmul.f32 %v3534_v6, %v3534_v6  ;;  %v1994_v57 = vmul.f32 %v3562_v50, %v3562_v50 }
 0x191   :  { %v2112_v59 = vadd.f32 %v2111_v41, %v1985_v14  ;;  %v1851_v22 = vadd.f32 %v1850_v37, %v3514_v51 }
 0x193   :  { %v1852_v18 = vadd.f32 %v3508_v36, %v1851_v22  ;;  %v2113_v47 = vadd.f32 %v2112_v59, %v1986_v52  ;;  %v1991_v36 = vmul.f32 %v3532_v1, %v3532_v1  ;;  %v1998_v52 = vmul.f32 %v3586_v21, %v3586_v21 }
 0x195   :  { %v2114_v29 = vadd.f32 %v2113_v47, %v1987_v9  ;;  %v1853_v33 = vadd.f32 %v3512_v45, %v1852_v18  ;;  %v1992_v45 = vmul.f32 %v3536_v10, %v3536_v10 }
 0x197   :  { %v1854_v15 = vadd.f32 %v1853_v33, %v3534_v6  ;;  %v2115_v60 = vadd.f32 %v2114_v29, %v1988_v17  ;;  %v1993_v6 = vmul.f32 %v3558_v39, %v3558_v39 }
 0x199   :  { %v2116_v54 = vadd.f32 %v2115_v60, %v1989_v42  ;;  %v1855_v51 = vadd.f32 %v1854_v15, %v3538_v16  ;;  %v2002_v15 = vmul.f32 %v3610_v61, %v3610_v61 }
 0x19b   :  { %v1856_v63 = vadd.f32 %v3532_v1, %v1855_v51  ;;  %v2117_v53 = vadd.f32 %v2116_v54, %v1990_v30  ;;  %v1995_v1 = vmul.f32 %v3556_v31, %v3556_v31 }
 0x19d   :  { %v2118_v62 = vadd.f32 %v2117_v53, %v1991_v36  ;;  %v1857_v38 = vadd.f32 %v3536_v10, %v1856_v63  ;;  %v1996_v10 = vmul.f32 %v3560_v43, %v3560_v43 }
 0x19f   :  { %v1858_v49 = vadd.f32 %v1857_v38, %v3558_v39  ;;  %v2119_v7 = vadd.f32 %v2118_v62, %v1992_v45  ;;  %v1997_v39 = vmul.f32 %v3582_v8, %v3582_v8  ;;  %v2006_v45 = vmul.f32 %v3634_v44, %v3634_v44 }
 0x1a1   :  { %v2120_v28 = vadd.f32 %v2119_v7, %v1993_v6  ;;  %v1859_v16 = vadd.f32 %v1858_v49, %v3562_v50 }
 0x1a3   :  { %v1860_v35 = vadd.f32 %v3556_v31, %v1859_v16  ;;  %v2121_v25 = vadd.f32 %v2120_v28, %v1994_v57  ;;  %v1999_v31 = vmul.f32 %v3580_v2, %v3580_v2  ;;  %v2010_v57 = vmul.f32 %v3658_v34, %v3658_v34 }
 0x1a5   :  { %v2122_v14 = vadd.f32 %v2121_v25, %v1995_v1  ;;  %v1861_v37 = vadd.f32 %v3560_v43, %v1860_v35  ;;  %v2000_v43 = vmul.f32 %v3584_v13, %v3584_v13 }
 0x1a7   :  { %v1862_v41 = vadd.f32 %v1861_v37, %v3582_v8  ;;  %v2123_v59 = vadd.f32 %v2122_v14, %v1996_v10  ;;  %v2001_v8 = vmul.f32 %v3606_v48, %v3606_v48 }
 0x1a9   :  { %v2124_v22 = vadd.f32 %v2123_v59, %v1997_v39  ;;  %v1863_v50 = vadd.f32 %v1862_v41, %v3586_v21  ;;  %v2014_v41 = vmul.f32 %v3682_v26, %v3682_v26 }
 0x1ab   :  { %v1864_v9 = vadd.f32 %v3580_v2, %v1863_v50  ;;  %v2125_v18 = vadd.f32 %v2124_v22, %v1998_v52  ;;  %v2003_v2 = vmul.f32 %v3604_v40, %v3604_v40  ;;  %v4059_v52 = vld [vmem:[#allocation3_spill] sm:$0xff] }
 0x1ad   :  { %v2126_v47 = vadd.f32 %v2125_v18, %v1999_v31  ;;  %v1865_v17 = vadd.f32 %v3584_v13, %v1864_v9  ;;  %v2004_v13 = vmul.f32 %v3608_v55, %v3608_v55 }
 0x1af   :  { %v1866_v29 = vadd.f32 %v1865_v17, %v3606_v48  ;;  %v2127_v33 = vadd.f32 %v2126_v47, %v2000_v43  ;;  %v2005_v48 = vmul.f32 %v3630_v27, %v3630_v27 }
 0x1b1   :  { %v2128_v42 = vadd.f32 %v2127_v33, %v2001_v8  ;;  %v1867_v21 = vadd.f32 %v1866_v29, %v3610_v61  ;;  %v4062_v33 = vld [vmem:[#allocation4_spill] sm:$0xff] }
 0x1b3   :  { %v1868_v60 = vadd.f32 %v3604_v40, %v1867_v21  ;;  %v2129_v54 = vadd.f32 %v2128_v42, %v2002_v15  ;;  %v2007_v40 = vmul.f32 %v3628_v19, %v3628_v19  ;;  %v2019_v42 = vmul.f32 %v4062_v33, %v4062_v33 }
 0x1b5   :  { %v2130_v51 = vadd.f32 %v2129_v54, %v2003_v2  ;;  %v1869_v30 = vadd.f32 %v3608_v55, %v1868_v60  ;;  %v2008_v55 = vmul.f32 %v3632_v32, %v3632_v32  ;;  %v4063_v2 = vld [vmem:[#allocation6_spill] sm:$0xff] }
 0x1b6   :  { %v2020_v60 = vmul.f32 %v4063_v2, %v4063_v2 }
 0x1b7   :  { %v1870_v36 = vadd.f32 %v1869_v30, %v3630_v27  ;;  %v2131_v63 = vadd.f32 %v2130_v51, %v2004_v13  ;;  %v2009_v27 = vmul.f32 %v3654_v12, %v3654_v12  ;;  %v4064_v51 = vld [vmem:[#allocation9_spill] sm:$0xff] }
 0x1b8   :  { %v2021_v30 = vmul.f32 %v4064_v51, %v4064_v51 }
 0x1b9   :  { %v2132_v53 = vadd.f32 %v2131_v63, %v2005_v48  ;;  %v1871_v61 = vadd.f32 %v1870_v36, %v3634_v44 }
 0x1bb   :  { %v1872_v62 = vadd.f32 %v3628_v19, %v1871_v61  ;;  %v2133_v38 = vadd.f32 %v2132_v53, %v2006_v45  ;;  %v2011_v19 = vmul.f32 %v3652_v3, %v3652_v3  ;;  %v4065_v53 = vld [vmem:[#allocation11_spill] sm:$0xff] }
 0x1bc   :  { %v2022_v45 = vmul.f32 %v4065_v53, %v4065_v53 }
 0x1bd   :  { %v2134_v6 = vadd.f32 %v2133_v38, %v2007_v40  ;;  %v1873_v49 = vadd.f32 %v3632_v32, %v1872_v62  ;;  %v2012_v32 = vmul.f32 %v3656_v20, %v3656_v20  ;;  %v4066_v40 = vld [vmem:[#allocation8_spill] sm:$0xff] }
 0x1be   :  { %v2023_v62 = vmul.f32 %v4066_v40, %v4066_v40 }
 0x1bf   :  { %v1874_v7 = vadd.f32 %v1873_v49, %v3654_v12  ;;  %v2135_v28 = vadd.f32 %v2134_v6, %v2008_v55  ;;  %v2013_v12 = vmul.f32 %v3678_v5, %v3678_v5  ;;  %v4067_v6 = vld [vmem:[#allocation10_spill] sm:$0xff] }
 0x1c0   :  { %v2024_v49 = vmul.f32 %v4067_v6, %v4067_v6 }
 0x1c1   :  { %v2136_v16 = vadd.f32 %v2135_v28, %v2009_v27  ;;  %v1875_v44 = vadd.f32 %v1874_v7, %v3658_v34  ;;  %v4068_v28 = vld [vmem:[#allocation13_spill] sm:$0xff] }
 0x1c3   :  { %v1876_v1 = vadd.f32 %v3652_v3, %v1875_v44  ;;  %v2137_v35 = vadd.f32 %v2136_v16, %v2010_v57  ;;  %v4058_v3 = vld [vmem:[#allocation2_spill] sm:$0xff]  ;;  %v2025_v16 = vmul.f32 %v4068_v28, %v4068_v28 }
 0x1c4   :  { %v2015_v59 = vmul.f32 %v4058_v3, %v4058_v3 }
 0x1c5   :  { %v2138_v25 = vadd.f32 %v2137_v35, %v2011_v19  ;;  %v1877_v10 = vadd.f32 %v3656_v20, %v1876_v1  ;;  %v2016_v20 = vmul.f32 %v4059_v52, %v4059_v52  ;;  %v4069_v1 = vld [vmem:[#allocation15_spill] sm:$0xff] }
 0x1c7   :  { %v1878_v14 = vadd.f32 %v1877_v10, %v3678_v5  ;;  %v2139_v37 = vadd.f32 %v2138_v25, %v2012_v32  ;;  %v4060_v5 = vld [vmem:[#allocation5_spill] sm:$0xff]  ;;  %v2026_v32 = vmul.f32 %v4069_v1, %v4069_v1  ;;  %v4070_v25 = vld [vmem:[#allocation12_spill] sm:$0xff] }
 0x1c8   :  { %v2017_v18 = vmul.f32 %v4060_v5, %v4060_v5  ;;  %v2027_v10 = vmul.f32 %v4070_v25, %v4070_v25 }
 0x1c9   :  { %v2140_v39 = vadd.f32 %v2139_v37, %v2013_v12  ;;  %v1879_v34 = vadd.f32 %v1878_v14, %v3682_v26  ;;  %v4061_v26 = vld [vmem:[#allocation7_spill] sm:$0xff]  ;;  %v4071_v37 = vld [vmem:[#allocation14_spill] sm:$0xff] }
 0x1ca   :  { %v2018_v29 = vmul.f32 %v4061_v26, %v4061_v26 }
 0x1cb   :  { %v1880_v22 = vadd.f32 %v4058_v3, %v1879_v34  ;;  %v2141_v50 = vadd.f32 %v2140_v39, %v2014_v41  ;;  %v2028_v39 = vmul.f32 %v4071_v37, %v4071_v37  ;;  %v2029_v3 = vmul.f32 %v3774_v24, %v3774_v24 }
 0x1cd   :  { %v2142_v31 = vadd.f32 %v2141_v50, %v2015_v59  ;;  %v1881_v9 = vadd.f32 %v4059_v52, %v1880_v22 }
 0x1cf   :  { %v1882_v43 = vadd.f32 %v1881_v9, %v4060_v5  ;;  %v2143_v47 = vadd.f32 %v2142_v31, %v2016_v20  ;;  %v2030_v20 = vmul.f32 %v3778_v58, %v3778_v58  ;;  %v2031_v31 = vmul.f32 %v3772_v23, %v3772_v23 }
 0x1d1   :  { %v2144_v17 = vadd.f32 %v2143_v47, %v2017_v18  ;;  %v1883_v8 = vadd.f32 %v1882_v43, %v4061_v26  ;;  %v2032_v18 = vmul.f32 %v3776_v56, %v3776_v56 }
 0x1d3   :  { %v1884_v21 = vadd.f32 %v4062_v33, %v1883_v8  ;;  %v2145_v15 = vadd.f32 %v2144_v17, %v2018_v29  ;;  %v2034_v29 = vmul.f32 %v3810_v4, %v3810_v4 }
 0x1d5   :  { %v2146_v54 = vadd.f32 %v2145_v15, %v2019_v42  ;;  %v1885_v13 = vadd.f32 %v4063_v2, %v1884_v21 }
 0x1d7   :  { %v1886_v48 = vadd.f32 %v1885_v13, %v4064_v51  ;;  %v2147_v36 = vadd.f32 %v2146_v54, %v2020_v60 }
 0x1d9   :  { %v2148_v63 = vadd.f32 %v2147_v36, %v2021_v30  ;;  %v1887_v61 = vadd.f32 %v1886_v48, %v4065_v53 }
 0x1db   :  { %v1888_v38 = vadd.f32 %v4066_v40, %v1887_v61  ;;  %v2149_v55 = vadd.f32 %v2148_v63, %v2022_v45 }
 0x1dd   :  { %v2150_v27 = vadd.f32 %v2149_v55, %v2023_v62  ;;  %v1889_v7 = vadd.f32 %v4067_v6, %v1888_v38 }
 0x1df   :  { %v1890_v44 = vadd.f32 %v1889_v7, %v4068_v28  ;;  %v2151_v57 = vadd.f32 %v2150_v27, %v2024_v49 }
 0x1e1   :  { %v2152_v19 = vadd.f32 %v2151_v57, %v2025_v16  ;;  %v1891_v35 = vadd.f32 %v1890_v44, %v4069_v1 }
 0x1e3   :  { %v1892_v12 = vadd.f32 %v4070_v25, %v1891_v35  ;;  %v2153_v14 = vadd.f32 %v2152_v19, %v2026_v32 }
 0x1e5   :  { %v2154_v34 = vadd.f32 %v2153_v14, %v2027_v10  ;;  %v1893_v41 = vadd.f32 %v4071_v37, %v1892_v12 }
 0x1e7   :  { %v1894_v59 = vadd.f32 %v1893_v41, %v3774_v24  ;;  %v2155_v22 = vadd.f32 %v2154_v34, %v2028_v39  ;;  %v2033_v24 = vmul.f32 %v3801_v11, %v3801_v11 }
 0x1e9   :  { %v2156_v50 = vadd.f32 %v2155_v22, %v2029_v3  ;;  %v1895_v52 = vadd.f32 %v1894_v59, %v3778_v58 }
 0x1eb   :  { %v1896_v9 = vadd.f32 %v3772_v23, %v1895_v52  ;;  %v2157_v5 = vadd.f32 %v2156_v50, %v2030_v20  ;;  %v2035_v23 = vmul.f32 %v3798_v46, %v3798_v46 }
 0x1ed   :  { %v2158_v43 = vadd.f32 %v2157_v5, %v2031_v31  ;;  %v1897_v47 = vadd.f32 %v3776_v56, %v1896_v9  ;;  %v2036_v56 = vmul.f32 %v3803_v0, %v3803_v0 }
 0x1ef   :  { %v1898_v17 = vadd.f32 %v1897_v47, %v3801_v11  ;;  %v2159_v26 = vadd.f32 %v2158_v43, %v2032_v18 }
 0x1f1   :  { %v2160_v8 = vadd.f32 %v2159_v26, %v2033_v24  ;;  %v1899_v58 = vadd.f32 %v1898_v17, %v3810_v4 }
 0x1f3   :  { %v1900_v33 = vadd.f32 %v3798_v46, %v1899_v58  ;;  %v2161_v42 = vadd.f32 %v2160_v8, %v2034_v29 }
 0x1f5   :  { %v1901_v21 = vadd.f32 %v3803_v0, %v1900_v33  ;;  %v2162_v15 = vadd.f32 %v2161_v42, %v2035_v23 }
 0x1f7   :  { %v1902_v11 = vrot.slane %v1901_v21, 4  ;;  %v2163_v2 = vadd.f32 %v2162_v15, %v2036_v56 }
 0x1f9   :  { %v1903_v60 = vadd.f32 %v1902_v11, %v1901_v21  ;;  %v2164_v54 = vrot.slane %v2163_v2, 4 }
 0x1fb   :  { %v1904_v13 = vrot.slane %v1903_v60, 2  ;;  %v2165_v51 = vadd.f32 %v2164_v54, %v2163_v2 }
 0x1fd   :  { %v1905_v30 = vadd.f32 %v1904_v13, %v1903_v60  ;;  %v2166_v4 = vrot.slane %v2165_v51, 2 }
 0x1ff   :  { %v1906_v48 = vrot.slane %v1905_v30, 1  ;;  %v2167_v36 = vadd.f32 %v2166_v4, %v2165_v51 }
 0x201   :  { %v1907_v63 = vadd.f32 %v1906_v48, %v1905_v30  ;;  %v2168_v53 = vrot.slane %v2167_v36, 1 }
 0x203   :  { %1908 = vst [vmem:[%s4015_s3] sm:$0x1] %v1907_v63  ;;  %v2169_v46 = vadd.f32 %v2168_v53, %v2167_v36 }
 0x205   :  { %2170 = vst [vmem:[%s4015_s3 + $0x1] sm:$0x1] %v2169_v46 }

// kernel: cbr_forward.3
= control target key start
LH: loop header
LB: loop body
LE: loop exit
PB: predicated region body
PF: predicated region fallthrough
CT: control target
= control target key end

     0   :  { %v268_v0 = vlaneseq  ;;  %s2381_s0 = inlined_call_operand.vmem [shape: bf16[1024,128], index: 0, kind: input, shape index: {}]   ;;  %s2382_s1 = inlined_call_operand.vmem [shape: f32[8,128], index: 1, kind: input, shape index: {}]   ;;  %s2383_s2 = inlined_call_operand.vmem [shape: f32[1024,128], index: 2, kind: output, shape index: {}]  }
   0x1   :  { %v1053_v1 = vld [vmem:[%s2381_s0] sm:$0xff]   ;;  %v1308_v2 = vld [vmem:[%s2381_s0 + $0x8] sm:$0xff]   ;;  %v1309_v7 = vld [vmem:[%s2381_s0 + $0x10] sm:$0xff]  }
   0x2   :  { %v1054_v3 = vunpack.c.l.bf16 %v1053_v1  ;;  %v269_v4 = vshrl.u32 %v268_v0, 7  ;;  %v1055_v5 = vunpack.c.h.bf16 %v1053_v1  ;;  %v1058_v6 = vunpack.c.l.bf16 %v1308_v2  ;;  %v1310_v8 = vld [vmem:[%s2381_s0 + $0x18] sm:$0xff]   ;;  %v1401_v9 = vld [vmem:[%s2381_s0 + $0x20] sm:$0xff]   ;;  %v1409_v15 = vld [vmem:[%s2381_s0 + $0x28] sm:$0xff]  }
   0x3   :  { %v267_v10 = vld [vmem:[%s2382_s1] sm:$0xff]  ;;  %v1059_v11 = vunpack.c.h.bf16 %v1308_v2  ;;  %v1062_v12 = vunpack.c.l.bf16 %v1309_v7  ;;  %v1063_v13 = vunpack.c.h.bf16 %v1309_v7  ;;  %v1066_v14 = vunpack.c.l.bf16 %v1310_v8  ;;  %v1414_v16 = vld [vmem:[%s2381_s0 + $0x30] sm:$0xff]   ;;  %v1419_v21 = vld [vmem:[%s2381_s0 + $0x38] sm:$0xff]  }
   0x4   :  { %v270_v17 = vsub.s32 0, %v269_v4  ;;  %v402_v18 = vsub.s32 1, %v269_v4  ;;  %v662_v19 = vsub.s32 2, %v269_v4  ;;  %v1067_v20 = vunpack.c.h.bf16 %v1310_v8  ;;  %v1424_v22 = vld [vmem:[%s2381_s0 + $0x40] sm:$0xff]  }
   0x5   :  { %v1070_v23 = vunpack.c.l.bf16 %v1401_v9  ;;  %v1071_v24 = vunpack.c.h.bf16 %v1401_v9  ;;  %v1074_v25 = vunpack.c.l.bf16 %v1409_v15  ;;  %v1075_v26 = vunpack.c.h.bf16 %v1409_v15 }
   0x6   :  { %v1430_v27 = vrot.slane %v267_v10, %v270_v17  ;;  %v1432_v28 = vrot.slane %v267_v10, %v402_v18  ;;  %v1434_v29 = vrot.slane %v267_v10, %v662_v19  ;;  %v1078_v30 = vunpack.c.l.bf16 %v1414_v16 }
   0x7   :  { %v1079_v31 = vunpack.c.h.bf16 %v1414_v16  ;;  %v1082_v32 = vunpack.c.l.bf16 %v1419_v21  ;;  %v1083_v33 = vunpack.c.h.bf16 %v1419_v21  ;;  %v1086_v34 = vunpack.c.l.bf16 %v1424_v22 }
   0x8   :  { %v272_v35 = vmul.f32 %v1054_v3, %v1430_v27  ;;  %v273_v36 = vmul.f32 %v1055_v5, %v1430_v27  ;;  %v274_v37 = vmul.f32 %v1058_v6, %v1430_v27  ;;  %v275_v38 = vmul.f32 %v1059_v11, %v1430_v27 }
   0x9   :  { %v276_v39 = vmul.f32 %v1062_v12, %v1430_v27  ;;  %v277_v40 = vmul.f32 %v1063_v13, %v1430_v27  ;;  %v278_v41 = vmul.f32 %v1066_v14, %v1430_v27  ;;  %v279_v42 = vmul.f32 %v1067_v20, %v1430_v27 }
   0xa   :  { %v404_v43 = vadd.f32 %v1432_v28, %v272_v35  ;;  %v405_v44 = vadd.f32 %v1432_v28, %v273_v36  ;;  %v406_v45 = vadd.f32 %v1432_v28, %v274_v37  ;;  %v407_v46 = vadd.f32 %v1432_v28, %v275_v38  ;;  %v1317_v38 = vld [vmem:[%s2381_s0 + $0x50] sm:$0xff]  }
   0xb   :  { %v408_v47 = vadd.f32 %v1432_v28, %v276_v39  ;;  %v409_v48 = vadd.f32 %v1432_v28, %v277_v40  ;;  %v410_v49 = vadd.f32 %v1432_v28, %v278_v41  ;;  %v411_v50 = vadd.f32 %v1432_v28, %v279_v42 }
   0xc   :  { %vm532_vm0 = vcmp.ge.f32.partialorder %v404_v43, 0.0  ;;  %v664_v51 = vmul.f32 %v1434_v29, %v404_v43  ;;  %vm533_vm1 = vcmp.ge.f32.partialorder %v405_v44, 0.0  ;;  %v665_v52 = vmul.f32 %v1434_v29, %v405_v44 }
   0xd   :  { %vm534_vm2 = vcmp.ge.f32.partialorder %v406_v45, 0.0  ;;  %v666_v53 = vmul.f32 %v1434_v29, %v406_v45  ;;  %vm535_vm3 = vcmp.ge.f32.partialorder %v407_v46, 0.0  ;;  %v667_v54 = vmul.f32 %v1434_v29, %v407_v46 }
   0xe   :  { %v792_v55 = vsel %vm532_vm0, %v404_v43, %v664_v51  ;;  %v793_v56 = vsel %vm533_vm1, %v405_v44, %v665_v52  ;;  %vm536_vm4 = vcmp.ge.f32.partialorder %v408_v47, 0.0  ;;  %v668_v57 = vmul.f32 %v1434_v29, %v408_v47 }
   0xf   :  { %920 = vst [vmem:[%s2383_s2] sm:$0xff] %v792_v55  ;;  %921 = vst [vmem:[%s2383_s2 + $0x8] sm:$0xff] %v793_v56  ;;  %v794_v58 = vsel %vm534_vm2, %v406_v45, %v666_v53  ;;  %v795_v59 = vsel %vm535_vm3, %v407_v46, %v667_v54  ;;  %vm537_vm5 = vcmp.ge.f32.partialorder %v409_v48, 0.0  ;;  %v669_v60 = vmul.f32 %v1434_v29, %v409_v48  ;;  %v1318_v45 = vld [vmem:[%s2381_s0 + $0x58] sm:$0xff]  }
  0x10   :  { %922 = vst [vmem:[%s2383_s2 + $0x10] sm:$0xff] %v794_v58  ;;  %923 = vst [vmem:[%s2383_s2 + $0x18] sm:$0xff] %v795_v59  ;;  %v796_v61 = vsel %vm536_vm4, %v408_v47, %v668_v57  ;;  %vm538_vm6 = vcmp.ge.f32.partialorder %v410_v49, 0.0  ;;  %v670_v62 = vmul.f32 %v1434_v29, %v410_v49  ;;  %vm539_vm7 = vcmp.ge.f32.partialorder %v411_v50, 0.0 }
  0x11   :  { %924 = vst [vmem:[%s2383_s2 + $0x20] sm:$0xff] %v796_v61  ;;  %v797_v63 = vsel %vm537_vm5, %v409_v48, %v669_v60  ;;  %v671_v0 = vmul.f32 %v1434_v29, %v411_v50  ;;  %v280_v1 = vmul.f32 %v1070_v23, %v1430_v27  ;;  %v281_v2 = vmul.f32 %v1071_v24, %v1430_v27 }
  0x12   :  { %925 = vst [vmem:[%s2383_s2 + $0x28] sm:$0xff] %v797_v63  ;;  %v798_v3 = vsel %vm538_vm6, %v410_v49, %v670_v62  ;;  %v282_v4 = vmul.f32 %v1074_v25, %v1430_v27  ;;  %v283_v5 = vmul.f32 %v1075_v26, %v1430_v27  ;;  %v284_v6 = vmul.f32 %v1078_v30, %v1430_v27  ;;  %v1319_v63 = vld [vmem:[%s2381_s0 + $0x60] sm:$0xff]  }
  0x13   :  { %926 = vst [vmem:[%s2383_s2 + $0x30] sm:$0xff] %v798_v3  ;;  %v799_v7 = vsel %vm539_vm7, %v411_v50, %v671_v0  ;;  %v412_v8 = vadd.f32 %v1432_v28, %v280_v1  ;;  %v413_v9 = vadd.f32 %v1432_v28, %v281_v2  ;;  %v285_v10 = vmul.f32 %v1079_v31, %v1430_v27  ;;  %v1316_v31 = vld [vmem:[%s2381_s0 + $0x48] sm:$0xff]  }
  0x14   :  { %927 = vst [vmem:[%s2383_s2 + $0x38] sm:$0xff] %v799_v7  ;;  %v414_v11 = vadd.f32 %v1432_v28, %v282_v4  ;;  %v415_v12 = vadd.f32 %v1432_v28, %v283_v5  ;;  %v416_v13 = vadd.f32 %v1432_v28, %v284_v6  ;;  %v286_v14 = vmul.f32 %v1082_v32, %v1430_v27 }
  0x15   :  { %vm540_vm8 = vcmp.ge.f32.partialorder %v412_v8, 0.0  ;;  %v672_v15 = vmul.f32 %v1434_v29, %v412_v8  ;;  %vm541_vm9 = vcmp.ge.f32.partialorder %v413_v9, 0.0  ;;  %v673_v16 = vmul.f32 %v1434_v29, %v413_v9 }
  0x16   :  { %vm542_vm10 = vcmp.ge.f32.partialorder %v414_v11, 0.0  ;;  %v674_v17 = vmul.f32 %v1434_v29, %v414_v11  ;;  %vm543_vm11 = vcmp.ge.f32.partialorder %v415_v12, 0.0  ;;  %v675_v18 = vmul.f32 %v1434_v29, %v415_v12 }
  0x17   :  { %v800_v19 = vsel %vm540_vm8, %v412_v8, %v672_v15  ;;  %v801_v20 = vsel %vm541_vm9, %v413_v9, %v673_v16  ;;  %vm544_vm12 = vcmp.ge.f32.partialorder %v416_v13, 0.0  ;;  %v676_v23 = vmul.f32 %v1434_v29, %v416_v13  ;;  %v1320_v9 = vld [vmem:[%s2381_s0 + $0x68] sm:$0xff]   ;;  %v1321_v16 = vld [vmem:[%s2381_s0 + $0x70] sm:$0xff]  }
  0x18   :  { %928 = vst [vmem:[%s2383_s2 + $0x40] sm:$0xff] %v800_v19  ;;  %929 = vst [vmem:[%s2383_s2 + $0x48] sm:$0xff] %v801_v20  ;;  %v802_v24 = vsel %vm542_vm10, %v414_v11, %v674_v17  ;;  %v803_v25 = vsel %vm543_vm11, %v415_v12, %v675_v18  ;;  %v417_v26 = vadd.f32 %v1432_v28, %v285_v10  ;;  %v1087_v37 = vunpack.c.h.bf16 %v1424_v22 }
  0x19   :  { %v418_v30 = vadd.f32 %v1432_v28, %v286_v14  ;;  %930 = vst [vmem:[%s2383_s2 + $0x50] sm:$0xff] %v802_v24  ;;  %931 = vst [vmem:[%s2383_s2 + $0x58] sm:$0xff] %v803_v25  ;;  %v804_v32 = vsel %vm544_vm12, %v416_v13, %v676_v23  ;;  %v287_v35 = vmul.f32 %v1083_v33, %v1430_v27  ;;  %v1090_v40 = vunpack.c.l.bf16 %v1316_v31 }
  0x1a   :  { %v288_v36 = vmul.f32 %v1086_v34, %v1430_v27  ;;  %932 = vst [vmem:[%s2383_s2 + $0x60] sm:$0xff] %v804_v32  ;;  %vm545_vm13 = vcmp.ge.f32.partialorder %v417_v26, 0.0  ;;  %v677_v39 = vmul.f32 %v1434_v29, %v417_v26  ;;  %v289_v22 = vmul.f32 %v1087_v37, %v1430_v27 }
  0x1b   :  { %vm546_vm14 = vcmp.ge.f32.partialorder %v418_v30, 0.0  ;;  %v678_v21 = vmul.f32 %v1434_v29, %v418_v30  ;;  %v419_v33 = vadd.f32 %v1432_v28, %v287_v35  ;;  %v1091_v43 = vunpack.c.h.bf16 %v1316_v31  ;;  %v1322_v35 = vld [vmem:[%s2381_s0 + $0x78] sm:$0xff]  }
  0x1c   :  { %v420_v34 = vadd.f32 %v1432_v28, %v288_v36  ;;  %v805_v41 = vsel %vm545_vm13, %v417_v26, %v677_v39  ;;  %v1094_v44 = vunpack.c.l.bf16 %v1317_v38  ;;  %v421_v48 = vadd.f32 %v1432_v28, %v289_v22 }
  0x1d   :  { %v806_v42 = vsel %vm546_vm14, %v418_v30, %v678_v21  ;;  %933 = vst [vmem:[%s2383_s2 + $0x68] sm:$0xff] %v805_v41  ;;  %vm547_vm15 = vcmp.ge.f32.partialorder %v419_v33, 0.0  ;;  %v679_v46 = vmul.f32 %v1434_v29, %v419_v33  ;;  %v290_v49 = vmul.f32 %v1090_v40, %v1430_v27 }
  0x1e   :  { %934 = vst [vmem:[%s2383_s2 + $0x70] sm:$0xff] %v806_v42  ;;  %vm548_vm0 = vcmp.ge.f32.partialorder %v420_v34, 0.0  ;;  %v680_v47 = vmul.f32 %v1434_v29, %v420_v34  ;;  %v291_v50 = vmul.f32 %v1091_v43, %v1430_v27  ;;  %v292_v51 = vmul.f32 %v1094_v44, %v1430_v27 }
  0x1f   :  { %v807_v52 = vsel %vm547_vm15, %v419_v33, %v679_v46  ;;  %v1095_v54 = vunpack.c.h.bf16 %v1317_v38  ;;  %v1098_v55 = vunpack.c.l.bf16 %v1318_v45  ;;  %vm549_vm1 = vcmp.ge.f32.partialorder %v421_v48, 0.0 }
  0x20   :  { %v808_v53 = vsel %vm548_vm0, %v420_v34, %v680_v47  ;;  %935 = vst [vmem:[%s2383_s2 + $0x78] sm:$0xff] %v807_v52  ;;  %v681_v56 = vmul.f32 %v1434_v29, %v421_v48  ;;  %v422_v57 = vadd.f32 %v1432_v28, %v290_v49  ;;  %v423_v58 = vadd.f32 %v1432_v28, %v291_v50 }
  0x21   :  { %936 = vst [vmem:[%s2383_s2 + $0x80] sm:$0xff] %v808_v53  ;;  %v424_v59 = vadd.f32 %v1432_v28, %v292_v51  ;;  %v293_v60 = vmul.f32 %v1095_v54, %v1430_v27  ;;  %v294_v61 = vmul.f32 %v1098_v55, %v1430_v27  ;;  %v1099_v62 = vunpack.c.h.bf16 %v1318_v45  ;;  %v1324_v53 = vld [vmem:[%s2381_s0 + $0x88] sm:$0xff]  }
  0x22   :  { %v809_v0 = vsel %vm549_vm1, %v421_v48, %v681_v56  ;;  %vm550_vm2 = vcmp.ge.f32.partialorder %v422_v57, 0.0  ;;  %v682_v1 = vmul.f32 %v1434_v29, %v422_v57  ;;  %vm551_vm3 = vcmp.ge.f32.partialorder %v423_v58, 0.0  ;;  %v1323_v48 = vld [vmem:[%s2381_s0 + $0x80] sm:$0xff]  }
  0x23   :  { %937 = vst [vmem:[%s2383_s2 + $0x88] sm:$0xff] %v809_v0  ;;  %v683_v2 = vmul.f32 %v1434_v29, %v423_v58  ;;  %vm552_vm4 = vcmp.ge.f32.partialorder %v424_v59, 0.0  ;;  %v684_v3 = vmul.f32 %v1434_v29, %v424_v59  ;;  %v425_v4 = vadd.f32 %v1432_v28, %v293_v60  ;;  %v1325_v0 = vld [vmem:[%s2381_s0 + $0x90] sm:$0xff]  }
  0x24   :  { %v810_v5 = vsel %vm550_vm2, %v422_v57, %v682_v1  ;;  %v426_v6 = vadd.f32 %v1432_v28, %v294_v61  ;;  %v295_v7 = vmul.f32 %v1099_v62, %v1430_v27  ;;  %v1102_v8 = vunpack.c.l.bf16 %v1319_v63 }
  0x25   :  { %938 = vst [vmem:[%s2383_s2 + $0x90] sm:$0xff] %v810_v5  ;;  %v811_v10 = vsel %vm551_vm3, %v423_v58, %v683_v2  ;;  %v812_v11 = vsel %vm552_vm4, %v424_v59, %v684_v3  ;;  %vm553_vm5 = vcmp.ge.f32.partialorder %v425_v4, 0.0  ;;  %v685_v12 = vmul.f32 %v1434_v29, %v425_v4 }
  0x26   :  { %939 = vst [vmem:[%s2383_s2 + $0x98] sm:$0xff] %v811_v10  ;;  %940 = vst [vmem:[%s2383_s2 + $0xa0] sm:$0xff] %v812_v11  ;;  %vm554_vm6 = vcmp.ge.f32.partialorder %v426_v6, 0.0  ;;  %v686_v13 = vmul.f32 %v1434_v29, %v426_v6  ;;  %v427_v14 = vadd.f32 %v1432_v28, %v295_v7  ;;  %v296_v15 = vmul.f32 %v1102_v8, %v1430_v27  ;;  %v1326_v7 = vld [vmem:[%s2381_s0 + $0x98] sm:$0xff]  }
  0x27   :  { %v813_v17 = vsel %vm553_vm5, %v425_v4, %v685_v12  ;;  %v1103_v18 = vunpack.c.h.bf16 %v1319_v63  ;;  %v1106_v19 = vunpack.c.l.bf16 %v1320_v9  ;;  %v1107_v20 = vunpack.c.h.bf16 %v1320_v9 }
  0x28   :  { %941 = vst [vmem:[%s2383_s2 + $0xa8] sm:$0xff] %v813_v17  ;;  %v814_v23 = vsel %vm554_vm6, %v426_v6, %v686_v13  ;;  %vm555_vm7 = vcmp.ge.f32.partialorder %v427_v14, 0.0  ;;  %v687_v24 = vmul.f32 %v1434_v29, %v427_v14  ;;  %v428_v25 = vadd.f32 %v1432_v28, %v296_v15 }
  0x29   :  { %942 = vst [vmem:[%s2383_s2 + $0xb0] sm:$0xff] %v814_v23  ;;  %v297_v26 = vmul.f32 %v1103_v18, %v1430_v27  ;;  %v298_v30 = vmul.f32 %v1106_v19, %v1430_v27  ;;  %v299_v31 = vmul.f32 %v1107_v20, %v1430_v27  ;;  %v1110_v32 = vunpack.c.l.bf16 %v1321_v16 }
  0x2a   :  { %v815_v36 = vsel %vm555_vm7, %v427_v14, %v687_v24  ;;  %vm556_vm8 = vcmp.ge.f32.partialorder %v428_v25, 0.0  ;;  %v688_v37 = vmul.f32 %v1434_v29, %v428_v25  ;;  %v1111_v38 = vunpack.c.h.bf16 %v1321_v16 }
  0x2b   :  { %943 = vst [vmem:[%s2383_s2 + $0xb8] sm:$0xff] %v815_v36  ;;  %v429_v39 = vadd.f32 %v1432_v28, %v297_v26  ;;  %v430_v21 = vadd.f32 %v1432_v28, %v298_v30  ;;  %v431_v33 = vadd.f32 %v1432_v28, %v299_v31  ;;  %v300_v34 = vmul.f32 %v1110_v32, %v1430_v27 }
  0x2c   :  { %v816_v22 = vsel %vm556_vm8, %v428_v25, %v688_v37  ;;  %v301_v40 = vmul.f32 %v1111_v38, %v1430_v27  ;;  %v1114_v41 = vunpack.c.l.bf16 %v1322_v35  ;;  %v1115_v42 = vunpack.c.h.bf16 %v1322_v35  ;;  %v1327_v35 = vld [vmem:[%s2381_s0 + $0xa0] sm:$0xff]  }
  0x2d   :  { %944 = vst [vmem:[%s2383_s2 + $0xc0] sm:$0xff] %v816_v22  ;;  %vm557_vm9 = vcmp.ge.f32.partialorder %v429_v39, 0.0  ;;  %v689_v43 = vmul.f32 %v1434_v29, %v429_v39  ;;  %vm558_vm10 = vcmp.ge.f32.partialorder %v430_v21, 0.0  ;;  %v690_v44 = vmul.f32 %v1434_v29, %v430_v21 }
  0x2e   :  { %vm559_vm11 = vcmp.ge.f32.partialorder %v431_v33, 0.0  ;;  %v691_v45 = vmul.f32 %v1434_v29, %v431_v33  ;;  %v432_v46 = vadd.f32 %v1432_v28, %v300_v34  ;;  %v433_v47 = vadd.f32 %v1432_v28, %v301_v40 }
  0x2f   :  { %v817_v49 = vsel %vm557_vm9, %v429_v39, %v689_v43  ;;  %v818_v50 = vsel %vm558_vm10, %v430_v21, %v690_v44  ;;  %v302_v51 = vmul.f32 %v1114_v41, %v1430_v27  ;;  %v303_v52 = vmul.f32 %v1115_v42, %v1430_v27  ;;  %v1328_v21 = vld [vmem:[%s2381_s0 + $0xa8] sm:$0xff]   ;;  %v1329_v43 = vld [vmem:[%s2381_s0 + $0xb0] sm:$0xff]  }
  0x30   :  { %945 = vst [vmem:[%s2383_s2 + $0xc8] sm:$0xff] %v817_v49  ;;  %946 = vst [vmem:[%s2383_s2 + $0xd0] sm:$0xff] %v818_v50  ;;  %v819_v54 = vsel %vm559_vm11, %v431_v33, %v691_v45  ;;  %vm560_vm12 = vcmp.ge.f32.partialorder %v432_v46, 0.0  ;;  %v692_v55 = vmul.f32 %v1434_v29, %v432_v46  ;;  %vm561_vm13 = vcmp.ge.f32.partialorder %v433_v47, 0.0 }
  0x31   :  { %947 = vst [vmem:[%s2383_s2 + $0xd8] sm:$0xff] %v819_v54  ;;  %v693_v56 = vmul.f32 %v1434_v29, %v433_v47  ;;  %v434_v57 = vadd.f32 %v1432_v28, %v302_v51  ;;  %v435_v58 = vadd.f32 %v1432_v28, %v303_v52  ;;  %v1118_v59 = vunpack.c.l.bf16 %v1323_v48 }
  0x32   :  { %v820_v60 = vsel %vm560_vm12, %v432_v46, %v692_v55  ;;  %v1119_v61 = vunpack.c.h.bf16 %v1323_v48  ;;  %v1122_v62 = vunpack.c.l.bf16 %v1324_v53  ;;  %v1123_v63 = vunpack.c.h.bf16 %v1324_v53 }
  0x33   :  { %948 = vst [vmem:[%s2383_s2 + $0xe0] sm:$0xff] %v820_v60  ;;  %v821_v1 = vsel %vm561_vm13, %v433_v47, %v693_v56  ;;  %vm562_vm14 = vcmp.ge.f32.partialorder %v434_v57, 0.0  ;;  %v694_v2 = vmul.f32 %v1434_v29, %v434_v57  ;;  %vm563_vm15 = vcmp.ge.f32.partialorder %v435_v58, 0.0 }
  0x34   :  { %949 = vst [vmem:[%s2383_s2 + $0xe8] sm:$0xff] %v821_v1  ;;  %v695_v3 = vmul.f32 %v1434_v29, %v435_v58  ;;  %v304_v4 = vmul.f32 %v1118_v59, %v1430_v27  ;;  %v305_v5 = vmul.f32 %v1119_v61, %v1430_v27  ;;  %v306_v6 = vmul.f32 %v1122_v62, %v1430_v27  ;;  %v1330_v1 = vld [vmem:[%s2381_s0 + $0xb8] sm:$0xff]  }
  0x35   :  { %v822_v8 = vsel %vm562_vm14, %v434_v57, %v694_v2  ;;  %v307_v9 = vmul.f32 %v1123_v63, %v1430_v27  ;;  %v1126_v10 = vunpack.c.l.bf16 %v1325_v0  ;;  %v1127_v11 = vunpack.c.h.bf16 %v1325_v0 }
  0x36   :  { %950 = vst [vmem:[%s2383_s2 + $0xf0] sm:$0xff] %v822_v8  ;;  %v823_v12 = vsel %vm563_vm15, %v435_v58, %v695_v3  ;;  %v436_v13 = vadd.f32 %v1432_v28, %v304_v4  ;;  %v437_v14 = vadd.f32 %v1432_v28, %v305_v5  ;;  %v438_v15 = vadd.f32 %v1432_v28, %v306_v6 }
  0x37   :  { %951 = vst [vmem:[%s2383_s2 + $0xf8] sm:$0xff] %v823_v12  ;;  %v439_v16 = vadd.f32 %v1432_v28, %v307_v9  ;;  %v308_v17 = vmul.f32 %v1126_v10, %v1430_v27  ;;  %v309_v18 = vmul.f32 %v1127_v11, %v1430_v27  ;;  %v1130_v19 = vunpack.c.l.bf16 %v1326_v7  ;;  %v1332_v12 = vld [vmem:[%s2381_s0 + $0xc8] sm:$0xff]  }
  0x38   :  { %vm564_vm0 = vcmp.ge.f32.partialorder %v436_v13, 0.0  ;;  %v696_v20 = vmul.f32 %v1434_v29, %v436_v13  ;;  %vm565_vm1 = vcmp.ge.f32.partialorder %v437_v14, 0.0  ;;  %v697_v23 = vmul.f32 %v1434_v29, %v437_v14 }
  0x39   :  { %vm566_vm2 = vcmp.ge.f32.partialorder %v438_v15, 0.0  ;;  %v698_v24 = vmul.f32 %v1434_v29, %v438_v15  ;;  %vm567_vm3 = vcmp.ge.f32.partialorder %v439_v16, 0.0  ;;  %v699_v25 = vmul.f32 %v1434_v29, %v439_v16 }
  0x3a   :  { %v824_v26 = vsel %vm564_vm0, %v436_v13, %v696_v20  ;;  %v825_v30 = vsel %vm565_vm1, %v437_v14, %v697_v23  ;;  %v440_v31 = vadd.f32 %v1432_v28, %v308_v17  ;;  %v441_v32 = vadd.f32 %v1432_v28, %v309_v18 }
  0x3b   :  { %952 = vst [vmem:[%s2383_s2 + $0x100] sm:$0xff] %v824_v26  ;;  %953 = vst [vmem:[%s2383_s2 + $0x108] sm:$0xff] %v825_v30  ;;  %v826_v36 = vsel %vm566_vm2, %v438_v15, %v698_v24  ;;  %v827_v37 = vsel %vm567_vm3, %v439_v16, %v699_v25  ;;  %v310_v38 = vmul.f32 %v1130_v19, %v1430_v27  ;;  %v1131_v39 = vunpack.c.h.bf16 %v1326_v7  ;;  %v1331_v7 = vld [vmem:[%s2381_s0 + $0xc0] sm:$0xff]  }
  0x3c   :  { %954 = vst [vmem:[%s2383_s2 + $0x110] sm:$0xff] %v826_v36  ;;  %955 = vst [vmem:[%s2383_s2 + $0x118] sm:$0xff] %v827_v37  ;;  %vm568_vm4 = vcmp.ge.f32.partialorder %v440_v31, 0.0  ;;  %v700_v33 = vmul.f32 %v1434_v29, %v440_v31  ;;  %vm569_vm5 = vcmp.ge.f32.partialorder %v441_v32, 0.0  ;;  %v701_v34 = vmul.f32 %v1434_v29, %v441_v32 }
  0x3d   :  { %v442_v22 = vadd.f32 %v1432_v28, %v310_v38  ;;  %v311_v40 = vmul.f32 %v1131_v39, %v1430_v27  ;;  %v1134_v41 = vunpack.c.l.bf16 %v1327_v35  ;;  %v1135_v42 = vunpack.c.h.bf16 %v1327_v35 }
  0x3e   :  { %v828_v44 = vsel %vm568_vm4, %v440_v31, %v700_v33  ;;  %v829_v45 = vsel %vm569_vm5, %v441_v32, %v701_v34  ;;  %v1138_v46 = vunpack.c.l.bf16 %v1328_v21  ;;  %v1139_v47 = vunpack.c.h.bf16 %v1328_v21 }
  0x3f   :  { %956 = vst [vmem:[%s2383_s2 + $0x120] sm:$0xff] %v828_v44  ;;  %957 = vst [vmem:[%s2383_s2 + $0x128] sm:$0xff] %v829_v45  ;;  %vm570_vm6 = vcmp.ge.f32.partialorder %v442_v22, 0.0  ;;  %v702_v48 = vmul.f32 %v1434_v29, %v442_v22  ;;  %v443_v49 = vadd.f32 %v1432_v28, %v311_v40  ;;  %v312_v50 = vmul.f32 %v1134_v41, %v1430_v27  ;;  %v1334_v44 = vld [vmem:[%s2381_s0 + $0xd8] sm:$0xff]  }
  0x40   :  { %v313_v51 = vmul.f32 %v1135_v42, %v1430_v27  ;;  %v314_v52 = vmul.f32 %v1138_v46, %v1430_v27  ;;  %v315_v53 = vmul.f32 %v1139_v47, %v1430_v27  ;;  %v1142_v54 = vunpack.c.l.bf16 %v1329_v43  ;;  %v1335_v47 = vld [vmem:[%s2381_s0 + $0xe0] sm:$0xff]  }
  0x41   :  { %v830_v55 = vsel %vm570_vm6, %v442_v22, %v702_v48  ;;  %vm571_vm7 = vcmp.ge.f32.partialorder %v443_v49, 0.0  ;;  %v703_v56 = vmul.f32 %v1434_v29, %v443_v49  ;;  %v444_v57 = vadd.f32 %v1432_v28, %v312_v50 }
  0x42   :  { %958 = vst [vmem:[%s2383_s2 + $0x130] sm:$0xff] %v830_v55  ;;  %v445_v58 = vadd.f32 %v1432_v28, %v313_v51  ;;  %v446_v59 = vadd.f32 %v1432_v28, %v314_v52  ;;  %v447_v60 = vadd.f32 %v1432_v28, %v315_v53  ;;  %v316_v61 = vmul.f32 %v1142_v54, %v1430_v27  ;;  %v1336_v55 = vld [vmem:[%s2381_s0 + $0xe8] sm:$0xff]  }
  0x43   :  { %v831_v62 = vsel %vm571_vm7, %v443_v49, %v703_v56  ;;  %vm572_vm8 = vcmp.ge.f32.partialorder %v444_v57, 0.0  ;;  %v704_v63 = vmul.f32 %v1434_v29, %v444_v57  ;;  %v1143_v0 = vunpack.c.h.bf16 %v1329_v43  ;;  %v1333_v43 = vld [vmem:[%s2381_s0 + $0xd0] sm:$0xff]  }
  0x44   :  { %959 = vst [vmem:[%s2383_s2 + $0x138] sm:$0xff] %v831_v62  ;;  %vm573_vm9 = vcmp.ge.f32.partialorder %v445_v58, 0.0  ;;  %v705_v2 = vmul.f32 %v1434_v29, %v445_v58  ;;  %vm574_vm10 = vcmp.ge.f32.partialorder %v446_v59, 0.0  ;;  %v706_v3 = vmul.f32 %v1434_v29, %v446_v59 }
  0x45   :  { %v832_v4 = vsel %vm572_vm8, %v444_v57, %v704_v63  ;;  %vm575_vm11 = vcmp.ge.f32.partialorder %v447_v60, 0.0  ;;  %v707_v5 = vmul.f32 %v1434_v29, %v447_v60  ;;  %v448_v6 = vadd.f32 %v1432_v28, %v316_v61 }
  0x46   :  { %960 = vst [vmem:[%s2383_s2 + $0x140] sm:$0xff] %v832_v4  ;;  %v833_v8 = vsel %vm573_vm9, %v445_v58, %v705_v2  ;;  %v834_v9 = vsel %vm574_vm10, %v446_v59, %v706_v3  ;;  %v317_v10 = vmul.f32 %v1143_v0, %v1430_v27  ;;  %v1146_v11 = vunpack.c.l.bf16 %v1330_v1 }
  0x47   :  { %961 = vst [vmem:[%s2383_s2 + $0x148] sm:$0xff] %v833_v8  ;;  %962 = vst [vmem:[%s2383_s2 + $0x150] sm:$0xff] %v834_v9  ;;  %v835_v13 = vsel %vm575_vm11, %v447_v60, %v707_v5  ;;  %vm576_vm12 = vcmp.ge.f32.partialorder %v448_v6, 0.0  ;;  %v708_v14 = vmul.f32 %v1434_v29, %v448_v6  ;;  %v1147_v15 = vunpack.c.h.bf16 %v1330_v1 }
  0x48   :  { %963 = vst [vmem:[%s2383_s2 + $0x158] sm:$0xff] %v835_v13  ;;  %v449_v16 = vadd.f32 %v1432_v28, %v317_v10  ;;  %v318_v17 = vmul.f32 %v1146_v11, %v1430_v27  ;;  %v1150_v18 = vunpack.c.l.bf16 %v1331_v7  ;;  %v1151_v19 = vunpack.c.h.bf16 %v1331_v7 }
  0x49   :  { %v836_v20 = vsel %vm576_vm12, %v448_v6, %v708_v14  ;;  %v319_v23 = vmul.f32 %v1147_v15, %v1430_v27  ;;  %v1154_v24 = vunpack.c.l.bf16 %v1332_v12  ;;  %v1155_v25 = vunpack.c.h.bf16 %v1332_v12 }
  0x4a   :  { %964 = vst [vmem:[%s2383_s2 + $0x160] sm:$0xff] %v836_v20  ;;  %vm577_vm13 = vcmp.ge.f32.partialorder %v449_v16, 0.0  ;;  %v709_v26 = vmul.f32 %v1434_v29, %v449_v16  ;;  %v450_v30 = vadd.f32 %v1432_v28, %v318_v17  ;;  %v320_v31 = vmul.f32 %v1150_v18, %v1430_v27 }
  0x4b   :  { %v451_v32 = vadd.f32 %v1432_v28, %v319_v23  ;;  %v321_v35 = vmul.f32 %v1151_v19, %v1430_v27  ;;  %v322_v36 = vmul.f32 %v1154_v24, %v1430_v27  ;;  %v323_v37 = vmul.f32 %v1155_v25, %v1430_v27 }
  0x4c   :  { %v837_v38 = vsel %vm577_vm13, %v449_v16, %v709_v26  ;;  %vm578_vm14 = vcmp.ge.f32.partialorder %v450_v30, 0.0  ;;  %v710_v39 = vmul.f32 %v1434_v29, %v450_v30  ;;  %v452_v21 = vadd.f32 %v1432_v28, %v320_v31  ;;  %v1337_v16 = vld [vmem:[%s2381_s0 + $0xf0] sm:$0xff]  }
  0x4d   :  { %965 = vst [vmem:[%s2383_s2 + $0x168] sm:$0xff] %v837_v38  ;;  %vm579_vm15 = vcmp.ge.f32.partialorder %v451_v32, 0.0  ;;  %v711_v33 = vmul.f32 %v1434_v29, %v451_v32  ;;  %v453_v34 = vadd.f32 %v1432_v28, %v321_v35  ;;  %v454_v22 = vadd.f32 %v1432_v28, %v322_v36  ;;  %v1338_v35 = vld [vmem:[%s2381_s0 + $0xf8] sm:$0xff]   ;;  %v1339_v38 = vld [vmem:[%s2381_s0 + $0x100] sm:$0xff]  }
  0x4e   :  { %v838_v40 = vsel %vm578_vm14, %v450_v30, %v710_v39  ;;  %vm580_vm0 = vcmp.ge.f32.partialorder %v452_v21, 0.0  ;;  %v712_v41 = vmul.f32 %v1434_v29, %v452_v21  ;;  %v455_v42 = vadd.f32 %v1432_v28, %v323_v37 }
  0x4f   :  { %966 = vst [vmem:[%s2383_s2 + $0x170] sm:$0xff] %v838_v40  ;;  %v839_v45 = vsel %vm579_vm15, %v451_v32, %v711_v33  ;;  %vm581_vm1 = vcmp.ge.f32.partialorder %v453_v34, 0.0  ;;  %v713_v46 = vmul.f32 %v1434_v29, %v453_v34  ;;  %vm582_vm2 = vcmp.ge.f32.partialorder %v454_v22, 0.0 }
  0x50   :  { %967 = vst [vmem:[%s2383_s2 + $0x178] sm:$0xff] %v839_v45  ;;  %v840_v48 = vsel %vm580_vm0, %v452_v21, %v712_v41  ;;  %v714_v49 = vmul.f32 %v1434_v29, %v454_v22  ;;  %vm583_vm3 = vcmp.ge.f32.partialorder %v455_v42, 0.0  ;;  %v715_v50 = vmul.f32 %v1434_v29, %v455_v42 }
  0x51   :  { %968 = vst [vmem:[%s2383_s2 + $0x180] sm:$0xff] %v840_v48  ;;  %v841_v51 = vsel %vm581_vm1, %v453_v34, %v713_v46  ;;  %v1158_v52 = vunpack.c.l.bf16 %v1333_v43  ;;  %v1159_v53 = vunpack.c.h.bf16 %v1333_v43  ;;  %v1162_v54 = vunpack.c.l.bf16 %v1334_v44  ;;  %v1340_v34 = vld [vmem:[%s2381_s0 + $0x108] sm:$0xff]  }
  0x52   :  { %969 = vst [vmem:[%s2383_s2 + $0x188] sm:$0xff] %v841_v51  ;;  %v842_v56 = vsel %vm582_vm2, %v454_v22, %v714_v49  ;;  %v843_v57 = vsel %vm583_vm3, %v455_v42, %v715_v50  ;;  %v1163_v58 = vunpack.c.h.bf16 %v1334_v44  ;;  %v1166_v59 = vunpack.c.l.bf16 %v1335_v47 }
  0x53   :  { %970 = vst [vmem:[%s2383_s2 + $0x190] sm:$0xff] %v842_v56  ;;  %971 = vst [vmem:[%s2383_s2 + $0x198] sm:$0xff] %v843_v57  ;;  %v324_v60 = vmul.f32 %v1158_v52, %v1430_v27  ;;  %v325_v61 = vmul.f32 %v1159_v53, %v1430_v27  ;;  %v326_v62 = vmul.f32 %v1162_v54, %v1430_v27  ;;  %v1167_v63 = vunpack.c.h.bf16 %v1335_v47 }
  0x54   :  { %v327_v0 = vmul.f32 %v1163_v58, %v1430_v27  ;;  %v328_v1 = vmul.f32 %v1166_v59, %v1430_v27  ;;  %v1170_v2 = vunpack.c.l.bf16 %v1336_v55  ;;  %v1171_v3 = vunpack.c.h.bf16 %v1336_v55 }
  0x55   :  { %v456_v4 = vadd.f32 %v1432_v28, %v324_v60  ;;  %v457_v5 = vadd.f32 %v1432_v28, %v325_v61  ;;  %v458_v6 = vadd.f32 %v1432_v28, %v326_v62  ;;  %v329_v7 = vmul.f32 %v1167_v63, %v1430_v27  ;;  %v1341_v61 = vld [vmem:[%s2381_s0 + $0x110] sm:$0xff]  }
  0x56   :  { %v459_v8 = vadd.f32 %v1432_v28, %v327_v0  ;;  %v460_v9 = vadd.f32 %v1432_v28, %v328_v1  ;;  %v330_v10 = vmul.f32 %v1170_v2, %v1430_v27  ;;  %v331_v11 = vmul.f32 %v1171_v3, %v1430_v27 }
  0x57   :  { %vm584_vm4 = vcmp.ge.f32.partialorder %v456_v4, 0.0  ;;  %v716_v12 = vmul.f32 %v1434_v29, %v456_v4  ;;  %vm585_vm5 = vcmp.ge.f32.partialorder %v457_v5, 0.0  ;;  %v717_v13 = vmul.f32 %v1434_v29, %v457_v5 }
  0x58   :  { %vm586_vm6 = vcmp.ge.f32.partialorder %v458_v6, 0.0  ;;  %v718_v14 = vmul.f32 %v1434_v29, %v458_v6  ;;  %vm587_vm7 = vcmp.ge.f32.partialorder %v459_v8, 0.0  ;;  %v719_v15 = vmul.f32 %v1434_v29, %v459_v8 }
  0x59   :  { %v844_v17 = vsel %vm584_vm4, %v456_v4, %v716_v12  ;;  %v845_v18 = vsel %vm585_vm5, %v457_v5, %v717_v13  ;;  %vm588_vm8 = vcmp.ge.f32.partialorder %v460_v9, 0.0  ;;  %v720_v19 = vmul.f32 %v1434_v29, %v460_v9 }
  0x5a   :  { %972 = vst [vmem:[%s2383_s2 + $0x1a0] sm:$0xff] %v844_v17  ;;  %973 = vst [vmem:[%s2383_s2 + $0x1a8] sm:$0xff] %v845_v18  ;;  %v846_v20 = vsel %vm586_vm6, %v458_v6, %v718_v14  ;;  %v847_v23 = vsel %vm587_vm7, %v459_v8, %v719_v15  ;;  %v461_v24 = vadd.f32 %v1432_v28, %v329_v7  ;;  %v1174_v31 = vunpack.c.l.bf16 %v1337_v16  ;;  %v1342_v8 = vld [vmem:[%s2381_s0 + $0x118] sm:$0xff]   ;;  %v1343_v14 = vld [vmem:[%s2381_s0 + $0x120] sm:$0xff]  }
  0x5b   :  { %v462_v25 = vadd.f32 %v1432_v28, %v330_v10  ;;  %974 = vst [vmem:[%s2383_s2 + $0x1b0] sm:$0xff] %v846_v20  ;;  %975 = vst [vmem:[%s2383_s2 + $0x1b8] sm:$0xff] %v847_v23  ;;  %v848_v26 = vsel %vm588_vm8, %v460_v9, %v720_v19  ;;  %v463_v30 = vadd.f32 %v1432_v28, %v331_v11  ;;  %v1175_v32 = vunpack.c.h.bf16 %v1337_v16 }
  0x5c   :  { %976 = vst [vmem:[%s2383_s2 + $0x1c0] sm:$0xff] %v848_v26  ;;  %vm589_vm9 = vcmp.ge.f32.partialorder %v461_v24, 0.0  ;;  %v721_v36 = vmul.f32 %v1434_v29, %v461_v24  ;;  %v332_v21 = vmul.f32 %v1174_v31, %v1430_v27  ;;  %v1178_v41 = vunpack.c.l.bf16 %v1338_v35  ;;  %v1344_v31 = vld [vmem:[%s2381_s0 + $0x128] sm:$0xff]  }
  0x5d   :  { %vm590_vm10 = vcmp.ge.f32.partialorder %v462_v25, 0.0  ;;  %v722_v37 = vmul.f32 %v1434_v29, %v462_v25  ;;  %vm591_vm11 = vcmp.ge.f32.partialorder %v463_v30, 0.0  ;;  %v723_v39 = vmul.f32 %v1434_v29, %v463_v30 }
  0x5e   :  { %v333_v33 = vmul.f32 %v1175_v32, %v1430_v27  ;;  %v849_v22 = vsel %vm589_vm9, %v461_v24, %v721_v36  ;;  %v1179_v42 = vunpack.c.h.bf16 %v1338_v35  ;;  %v464_v44 = vadd.f32 %v1432_v28, %v332_v21 }
  0x5f   :  { %v850_v40 = vsel %vm590_vm10, %v462_v25, %v722_v37  ;;  %977 = vst [vmem:[%s2383_s2 + $0x1c8] sm:$0xff] %v849_v22  ;;  %v851_v43 = vsel %vm591_vm11, %v463_v30, %v723_v39  ;;  %v1182_v46 = vunpack.c.l.bf16 %v1339_v38  ;;  %v334_v47 = vmul.f32 %v1178_v41, %v1430_v27 }
  0x60   :  { %978 = vst [vmem:[%s2383_s2 + $0x1d0] sm:$0xff] %v850_v40  ;;  %v465_v45 = vadd.f32 %v1432_v28, %v333_v33  ;;  %979 = vst [vmem:[%s2383_s2 + $0x1d8] sm:$0xff] %v851_v43  ;;  %v335_v48 = vmul.f32 %v1179_v42, %v1430_v27  ;;  %v1183_v49 = vunpack.c.h.bf16 %v1339_v38  ;;  %v1186_v50 = vunpack.c.l.bf16 %v1340_v34  ;;  %v1345_v40 = vld [vmem:[%s2381_s0 + $0x130] sm:$0xff]  }
  0x61   :  { %vm592_vm12 = vcmp.ge.f32.partialorder %v464_v44, 0.0  ;;  %v724_v51 = vmul.f32 %v1434_v29, %v464_v44  ;;  %v466_v53 = vadd.f32 %v1432_v28, %v334_v47  ;;  %v336_v55 = vmul.f32 %v1182_v46, %v1430_v27 }
  0x62   :  { %vm593_vm13 = vcmp.ge.f32.partialorder %v465_v45, 0.0  ;;  %v725_v52 = vmul.f32 %v1434_v29, %v465_v45  ;;  %v467_v54 = vadd.f32 %v1432_v28, %v335_v48  ;;  %v337_v56 = vmul.f32 %v1183_v49, %v1430_v27 }
  0x63   :  { %v852_v57 = vsel %vm592_vm12, %v464_v44, %v724_v51  ;;  %v338_v59 = vmul.f32 %v1186_v50, %v1430_v27  ;;  %v1187_v60 = vunpack.c.h.bf16 %v1340_v34  ;;  %vm594_vm14 = vcmp.ge.f32.partialorder %v466_v53, 0.0  ;;  %v1346_v51 = vld [vmem:[%s2381_s0 + $0x138] sm:$0xff]  }
  0x64   :  { %v853_v58 = vsel %vm593_vm13, %v465_v45, %v725_v52  ;;  %980 = vst [vmem:[%s2383_s2 + $0x1e0] sm:$0xff] %v852_v57  ;;  %v726_v62 = vmul.f32 %v1434_v29, %v466_v53  ;;  %vm595_vm15 = vcmp.ge.f32.partialorder %v467_v54, 0.0  ;;  %v727_v63 = vmul.f32 %v1434_v29, %v467_v54 }
  0x65   :  { %981 = vst [vmem:[%s2383_s2 + $0x1e8] sm:$0xff] %v853_v58  ;;  %v468_v0 = vadd.f32 %v1432_v28, %v336_v55  ;;  %v469_v1 = vadd.f32 %v1432_v28, %v337_v56  ;;  %v470_v2 = vadd.f32 %v1432_v28, %v338_v59  ;;  %v339_v3 = vmul.f32 %v1187_v60, %v1430_v27  ;;  %v1347_v58 = vld [vmem:[%s2381_s0 + $0x140] sm:$0xff]  }
  0x66   :  { %v854_v4 = vsel %vm594_vm14, %v466_v53, %v726_v62  ;;  %v855_v5 = vsel %vm595_vm15, %v467_v54, %v727_v63  ;;  %v1190_v6 = vunpack.c.l.bf16 %v1341_v61  ;;  %v1191_v7 = vunpack.c.h.bf16 %v1341_v61 }
  0x67   :  { %982 = vst [vmem:[%s2383_s2 + $0x1f0] sm:$0xff] %v854_v4  ;;  %983 = vst [vmem:[%s2383_s2 + $0x1f8] sm:$0xff] %v855_v5  ;;  %vm596_vm0 = vcmp.ge.f32.partialorder %v468_v0, 0.0  ;;  %v728_v9 = vmul.f32 %v1434_v29, %v468_v0  ;;  %vm597_vm1 = vcmp.ge.f32.partialorder %v469_v1, 0.0  ;;  %v729_v10 = vmul.f32 %v1434_v29, %v469_v1 }
  0x68   :  { %vm598_vm2 = vcmp.ge.f32.partialorder %v470_v2, 0.0  ;;  %v730_v11 = vmul.f32 %v1434_v29, %v470_v2  ;;  %v471_v12 = vadd.f32 %v1432_v28, %v339_v3  ;;  %v340_v13 = vmul.f32 %v1190_v6, %v1430_v27  ;;  %v1348_v6 = vld [vmem:[%s2381_s0 + $0x148] sm:$0xff]  }
  0x69   :  { %v856_v15 = vsel %vm596_vm0, %v468_v0, %v728_v9  ;;  %v857_v16 = vsel %vm597_vm1, %v469_v1, %v729_v10  ;;  %v341_v17 = vmul.f32 %v1191_v7, %v1430_v27  ;;  %v1194_v18 = vunpack.c.l.bf16 %v1342_v8 }
  0x6a   :  { %984 = vst [vmem:[%s2383_s2 + $0x200] sm:$0xff] %v856_v15  ;;  %985 = vst [vmem:[%s2383_s2 + $0x208] sm:$0xff] %v857_v16  ;;  %v858_v19 = vsel %vm598_vm2, %v470_v2, %v730_v11  ;;  %vm599_vm3 = vcmp.ge.f32.partialorder %v471_v12, 0.0  ;;  %v731_v20 = vmul.f32 %v1434_v29, %v471_v12  ;;  %v472_v23 = vadd.f32 %v1432_v28, %v340_v13 }
  0x6b   :  { %986 = vst [vmem:[%s2383_s2 + $0x210] sm:$0xff] %v858_v19  ;;  %v473_v24 = vadd.f32 %v1432_v28, %v341_v17  ;;  %v342_v25 = vmul.f32 %v1194_v18, %v1430_v27  ;;  %v1195_v26 = vunpack.c.h.bf16 %v1342_v8  ;;  %v1198_v30 = vunpack.c.l.bf16 %v1343_v14  ;;  %v1349_v17 = vld [vmem:[%s2381_s0 + $0x150] sm:$0xff]  }
  0x6c   :  { %v859_v32 = vsel %vm599_vm3, %v471_v12, %v731_v20  ;;  %vm600_vm4 = vcmp.ge.f32.partialorder %v472_v23, 0.0  ;;  %v732_v35 = vmul.f32 %v1434_v29, %v472_v23  ;;  %v1199_v36 = vunpack.c.h.bf16 %v1343_v14 }
  0x6d   :  { %987 = vst [vmem:[%s2383_s2 + $0x218] sm:$0xff] %v859_v32  ;;  %vm601_vm5 = vcmp.ge.f32.partialorder %v473_v24, 0.0  ;;  %v733_v37 = vmul.f32 %v1434_v29, %v473_v24  ;;  %v474_v38 = vadd.f32 %v1432_v28, %v342_v25  ;;  %v343_v39 = vmul.f32 %v1195_v26, %v1430_v27 }
  0x6e   :  { %v860_v21 = vsel %vm600_vm4, %v472_v23, %v732_v35  ;;  %v344_v33 = vmul.f32 %v1198_v30, %v1430_v27  ;;  %v345_v34 = vmul.f32 %v1199_v36, %v1430_v27  ;;  %v1202_v22 = vunpack.c.l.bf16 %v1344_v31  ;;  %v1350_v35 = vld [vmem:[%s2381_s0 + $0x158] sm:$0xff]  }
  0x6f   :  { %988 = vst [vmem:[%s2383_s2 + $0x220] sm:$0xff] %v860_v21  ;;  %v861_v41 = vsel %vm601_vm5, %v473_v24, %v733_v37  ;;  %vm602_vm6 = vcmp.ge.f32.partialorder %v474_v38, 0.0  ;;  %v734_v42 = vmul.f32 %v1434_v29, %v474_v38  ;;  %v475_v43 = vadd.f32 %v1432_v28, %v343_v39 }
  0x70   :  { %989 = vst [vmem:[%s2383_s2 + $0x228] sm:$0xff] %v861_v41  ;;  %v476_v44 = vadd.f32 %v1432_v28, %v344_v33  ;;  %v477_v45 = vadd.f32 %v1432_v28, %v345_v34  ;;  %v346_v46 = vmul.f32 %v1202_v22, %v1430_v27  ;;  %v1203_v47 = vunpack.c.h.bf16 %v1344_v31 }
  0x71   :  { %v862_v48 = vsel %vm602_vm6, %v474_v38, %v734_v42  ;;  %vm603_vm7 = vcmp.ge.f32.partialorder %v475_v43, 0.0  ;;  %v735_v49 = vmul.f32 %v1434_v29, %v475_v43  ;;  %v1206_v50 = vunpack.c.l.bf16 %v1345_v40  ;;  %v1351_v42 = vld [vmem:[%s2381_s0 + $0x160] sm:$0xff]  }
  0x72   :  { %990 = vst [vmem:[%s2383_s2 + $0x230] sm:$0xff] %v862_v48  ;;  %vm604_vm8 = vcmp.ge.f32.partialorder %v476_v44, 0.0  ;;  %v736_v52 = vmul.f32 %v1434_v29, %v476_v44  ;;  %vm605_vm9 = vcmp.ge.f32.partialorder %v477_v45, 0.0  ;;  %v737_v53 = vmul.f32 %v1434_v29, %v477_v45 }
  0x73   :  { %v863_v54 = vsel %vm603_vm7, %v475_v43, %v735_v49  ;;  %v478_v55 = vadd.f32 %v1432_v28, %v346_v46  ;;  %v347_v56 = vmul.f32 %v1203_v47, %v1430_v27  ;;  %v348_v57 = vmul.f32 %v1206_v50, %v1430_v27 }
  0x74   :  { %991 = vst [vmem:[%s2383_s2 + $0x238] sm:$0xff] %v863_v54  ;;  %v864_v59 = vsel %vm604_vm8, %v476_v44, %v736_v52  ;;  %v865_v60 = vsel %vm605_vm9, %v477_v45, %v737_v53  ;;  %v1207_v61 = vunpack.c.h.bf16 %v1345_v40  ;;  %v1210_v62 = vunpack.c.l.bf16 %v1346_v51  ;;  %v1352_v53 = vld [vmem:[%s2381_s0 + $0x168] sm:$0xff]  }
  0x75   :  { %992 = vst [vmem:[%s2383_s2 + $0x240] sm:$0xff] %v864_v59  ;;  %993 = vst [vmem:[%s2383_s2 + $0x248] sm:$0xff] %v865_v60  ;;  %vm606_vm10 = vcmp.ge.f32.partialorder %v478_v55, 0.0  ;;  %v738_v63 = vmul.f32 %v1434_v29, %v478_v55  ;;  %v479_v0 = vadd.f32 %v1432_v28, %v347_v56  ;;  %v480_v1 = vadd.f32 %v1432_v28, %v348_v57 }
  0x76   :  { %v349_v2 = vmul.f32 %v1207_v61, %v1430_v27  ;;  %v350_v3 = vmul.f32 %v1210_v62, %v1430_v27  ;;  %v1211_v4 = vunpack.c.h.bf16 %v1346_v51  ;;  %v1214_v5 = vunpack.c.l.bf16 %v1347_v58 }
  0x77   :  { %v866_v7 = vsel %vm606_vm10, %v478_v55, %v738_v63  ;;  %vm607_vm11 = vcmp.ge.f32.partialorder %v479_v0, 0.0  ;;  %v739_v8 = vmul.f32 %v1434_v29, %v479_v0  ;;  %vm608_vm12 = vcmp.ge.f32.partialorder %v480_v1, 0.0 }
  0x78   :  { %994 = vst [vmem:[%s2383_s2 + $0x250] sm:$0xff] %v866_v7  ;;  %v740_v9 = vmul.f32 %v1434_v29, %v480_v1  ;;  %v481_v10 = vadd.f32 %v1432_v28, %v349_v2  ;;  %v482_v11 = vadd.f32 %v1432_v28, %v350_v3  ;;  %v351_v12 = vmul.f32 %v1211_v4, %v1430_v27 }
  0x79   :  { %v867_v13 = vsel %vm607_vm11, %v479_v0, %v739_v8  ;;  %v352_v14 = vmul.f32 %v1214_v5, %v1430_v27  ;;  %v1215_v15 = vunpack.c.h.bf16 %v1347_v58  ;;  %v1218_v16 = vunpack.c.l.bf16 %v1348_v6  ;;  %v1353_v0 = vld [vmem:[%s2381_s0 + $0x170] sm:$0xff]  }
  0x7a   :  { %995 = vst [vmem:[%s2383_s2 + $0x258] sm:$0xff] %v867_v13  ;;  %v868_v18 = vsel %vm608_vm12, %v480_v1, %v740_v9  ;;  %vm609_vm13 = vcmp.ge.f32.partialorder %v481_v10, 0.0  ;;  %v741_v19 = vmul.f32 %v1434_v29, %v481_v10  ;;  %vm610_vm14 = vcmp.ge.f32.partialorder %v482_v11, 0.0 }
  0x7b   :  { %996 = vst [vmem:[%s2383_s2 + $0x260] sm:$0xff] %v868_v18  ;;  %v742_v20 = vmul.f32 %v1434_v29, %v482_v11  ;;  %v483_v23 = vadd.f32 %v1432_v28, %v351_v12  ;;  %v484_v24 = vadd.f32 %v1432_v28, %v352_v14  ;;  %v353_v25 = vmul.f32 %v1215_v15, %v1430_v27 }
  0x7c   :  { %v869_v26 = vsel %vm609_vm13, %v481_v10, %v741_v19  ;;  %v354_v30 = vmul.f32 %v1218_v16, %v1430_v27  ;;  %v1219_v31 = vunpack.c.h.bf16 %v1348_v6  ;;  %v1222_v32 = vunpack.c.l.bf16 %v1349_v17 }
  0x7d   :  { %997 = vst [vmem:[%s2383_s2 + $0x268] sm:$0xff] %v869_v26  ;;  %v870_v36 = vsel %vm610_vm14, %v482_v11, %v742_v20  ;;  %vm611_vm15 = vcmp.ge.f32.partialorder %v483_v23, 0.0  ;;  %v743_v37 = vmul.f32 %v1434_v29, %v483_v23  ;;  %vm612_vm0 = vcmp.ge.f32.partialorder %v484_v24, 0.0  ;;  %v1354_v11 = vld [vmem:[%s2381_s0 + $0x178] sm:$0xff]  }
  0x7e   :  { %998 = vst [vmem:[%s2383_s2 + $0x270] sm:$0xff] %v870_v36  ;;  %v744_v38 = vmul.f32 %v1434_v29, %v484_v24  ;;  %v485_v39 = vadd.f32 %v1432_v28, %v353_v25  ;;  %v486_v21 = vadd.f32 %v1432_v28, %v354_v30  ;;  %v355_v33 = vmul.f32 %v1219_v31, %v1430_v27 }
  0x7f   :  { %v871_v34 = vsel %vm611_vm15, %v483_v23, %v743_v37  ;;  %v356_v22 = vmul.f32 %v1222_v32, %v1430_v27  ;;  %v1223_v40 = vunpack.c.h.bf16 %v1349_v17  ;;  %v1226_v41 = vunpack.c.l.bf16 %v1350_v35 }
  0x80   :  { %999 = vst [vmem:[%s2383_s2 + $0x278] sm:$0xff] %v871_v34  ;;  %v872_v43 = vsel %vm612_vm0, %v484_v24, %v744_v38  ;;  %vm613_vm1 = vcmp.ge.f32.partialorder %v485_v39, 0.0  ;;  %v745_v44 = vmul.f32 %v1434_v29, %v485_v39  ;;  %vm614_vm2 = vcmp.ge.f32.partialorder %v486_v21, 0.0  ;;  %v1355_v24 = vld [vmem:[%s2381_s0 + $0x180] sm:$0xff]  }
  0x81   :  { %1000 = vst [vmem:[%s2383_s2 + $0x280] sm:$0xff] %v872_v43  ;;  %v746_v45 = vmul.f32 %v1434_v29, %v486_v21  ;;  %v487_v46 = vadd.f32 %v1432_v28, %v355_v33  ;;  %v488_v47 = vadd.f32 %v1432_v28, %v356_v22  ;;  %v357_v48 = vmul.f32 %v1223_v40, %v1430_v27 }
  0x82   :  { %v873_v49 = vsel %vm613_vm1, %v485_v39, %v745_v44  ;;  %v358_v50 = vmul.f32 %v1226_v41, %v1430_v27  ;;  %v1227_v51 = vunpack.c.h.bf16 %v1350_v35  ;;  %v1230_v52 = vunpack.c.l.bf16 %v1351_v42 }
  0x83   :  { %1001 = vst [vmem:[%s2383_s2 + $0x288] sm:$0xff] %v873_v49  ;;  %v874_v54 = vsel %vm614_vm2, %v486_v21, %v746_v45  ;;  %vm615_vm3 = vcmp.ge.f32.partialorder %v487_v46, 0.0  ;;  %v747_v55 = vmul.f32 %v1434_v29, %v487_v46  ;;  %vm616_vm4 = vcmp.ge.f32.partialorder %v488_v47, 0.0  ;;  %v1356_v21 = vld [vmem:[%s2381_s0 + $0x188] sm:$0xff]  }
  0x84   :  { %1002 = vst [vmem:[%s2383_s2 + $0x290] sm:$0xff] %v874_v54  ;;  %v748_v56 = vmul.f32 %v1434_v29, %v488_v47  ;;  %v489_v57 = vadd.f32 %v1432_v28, %v357_v48  ;;  %v490_v58 = vadd.f32 %v1432_v28, %v358_v50  ;;  %v359_v59 = vmul.f32 %v1227_v51, %v1430_v27 }
  0x85   :  { %v875_v60 = vsel %vm615_vm3, %v487_v46, %v747_v55  ;;  %v360_v61 = vmul.f32 %v1230_v52, %v1430_v27  ;;  %v1231_v62 = vunpack.c.h.bf16 %v1351_v42  ;;  %v1234_v63 = vunpack.c.l.bf16 %v1352_v53 }
  0x86   :  { %1003 = vst [vmem:[%s2383_s2 + $0x298] sm:$0xff] %v875_v60  ;;  %v876_v1 = vsel %vm616_vm4, %v488_v47, %v748_v56  ;;  %vm617_vm5 = vcmp.ge.f32.partialorder %v489_v57, 0.0  ;;  %v749_v2 = vmul.f32 %v1434_v29, %v489_v57  ;;  %vm618_vm6 = vcmp.ge.f32.partialorder %v490_v58, 0.0  ;;  %v1357_v47 = vld [vmem:[%s2381_s0 + $0x190] sm:$0xff]  }
  0x87   :  { %1004 = vst [vmem:[%s2383_s2 + $0x2a0] sm:$0xff] %v876_v1  ;;  %v750_v3 = vmul.f32 %v1434_v29, %v490_v58  ;;  %v491_v4 = vadd.f32 %v1432_v28, %v359_v59  ;;  %v492_v5 = vadd.f32 %v1432_v28, %v360_v61  ;;  %v361_v6 = vmul.f32 %v1231_v62, %v1430_v27 }
  0x88   :  { %v877_v7 = vsel %vm617_vm5, %v489_v57, %v749_v2  ;;  %v362_v8 = vmul.f32 %v1234_v63, %v1430_v27  ;;  %v1235_v9 = vunpack.c.h.bf16 %v1352_v53  ;;  %v1238_v10 = vunpack.c.l.bf16 %v1353_v0 }
  0x89   :  { %1005 = vst [vmem:[%s2383_s2 + $0x2a8] sm:$0xff] %v877_v7  ;;  %v878_v12 = vsel %vm618_vm6, %v490_v58, %v750_v3  ;;  %vm619_vm7 = vcmp.ge.f32.partialorder %v491_v4, 0.0  ;;  %v751_v13 = vmul.f32 %v1434_v29, %v491_v4  ;;  %vm620_vm8 = vcmp.ge.f32.partialorder %v492_v5, 0.0  ;;  %v1358_v58 = vld [vmem:[%s2381_s0 + $0x198] sm:$0xff]  }
  0x8a   :  { %1006 = vst [vmem:[%s2383_s2 + $0x2b0] sm:$0xff] %v878_v12  ;;  %v752_v14 = vmul.f32 %v1434_v29, %v492_v5  ;;  %v493_v15 = vadd.f32 %v1432_v28, %v361_v6  ;;  %v494_v16 = vadd.f32 %v1432_v28, %v362_v8  ;;  %v363_v17 = vmul.f32 %v1235_v9, %v1430_v27 }
  0x8b   :  { %v879_v18 = vsel %vm619_vm7, %v491_v4, %v751_v13  ;;  %v364_v19 = vmul.f32 %v1238_v10, %v1430_v27  ;;  %v1239_v20 = vunpack.c.h.bf16 %v1353_v0  ;;  %v1242_v23 = vunpack.c.l.bf16 %v1354_v11 }
  0x8c   :  { %1007 = vst [vmem:[%s2383_s2 + $0x2b8] sm:$0xff] %v879_v18  ;;  %v880_v25 = vsel %vm620_vm8, %v492_v5, %v752_v14  ;;  %vm621_vm9 = vcmp.ge.f32.partialorder %v493_v15, 0.0  ;;  %v753_v26 = vmul.f32 %v1434_v29, %v493_v15  ;;  %vm622_vm10 = vcmp.ge.f32.partialorder %v494_v16, 0.0  ;;  %v1359_v5 = vld [vmem:[%s2381_s0 + $0x1a0] sm:$0xff]  }
  0x8d   :  { %1008 = vst [vmem:[%s2383_s2 + $0x2c0] sm:$0xff] %v880_v25  ;;  %v754_v30 = vmul.f32 %v1434_v29, %v494_v16  ;;  %v495_v31 = vadd.f32 %v1432_v28, %v363_v17  ;;  %v496_v32 = vadd.f32 %v1432_v28, %v364_v19  ;;  %v365_v35 = vmul.f32 %v1239_v20, %v1430_v27 }
  0x8e   :  { %v881_v36 = vsel %vm621_vm9, %v493_v15, %v753_v26  ;;  %v366_v37 = vmul.f32 %v1242_v23, %v1430_v27  ;;  %v1243_v38 = vunpack.c.h.bf16 %v1354_v11  ;;  %v1246_v39 = vunpack.c.l.bf16 %v1355_v24 }
  0x8f   :  { %1009 = vst [vmem:[%s2383_s2 + $0x2c8] sm:$0xff] %v881_v36  ;;  %v882_v33 = vsel %vm622_vm10, %v494_v16, %v754_v30  ;;  %vm623_vm11 = vcmp.ge.f32.partialorder %v495_v31, 0.0  ;;  %v755_v34 = vmul.f32 %v1434_v29, %v495_v31  ;;  %vm624_vm12 = vcmp.ge.f32.partialorder %v496_v32, 0.0  ;;  %v1360_v16 = vld [vmem:[%s2381_s0 + $0x1a8] sm:$0xff]  }
  0x90   :  { %1010 = vst [vmem:[%s2383_s2 + $0x2d0] sm:$0xff] %v882_v33  ;;  %v756_v22 = vmul.f32 %v1434_v29, %v496_v32  ;;  %v497_v40 = vadd.f32 %v1432_v28, %v365_v35  ;;  %v498_v41 = vadd.f32 %v1432_v28, %v366_v37  ;;  %v367_v42 = vmul.f32 %v1243_v38, %v1430_v27 }
  0x91   :  { %v883_v43 = vsel %vm623_vm11, %v495_v31, %v755_v34  ;;  %v368_v44 = vmul.f32 %v1246_v39, %v1430_v27  ;;  %v1247_v45 = vunpack.c.h.bf16 %v1355_v24  ;;  %v1250_v46 = vunpack.c.l.bf16 %v1356_v21 }
  0x92   :  { %1011 = vst [vmem:[%s2383_s2 + $0x2d8] sm:$0xff] %v883_v43  ;;  %v884_v48 = vsel %vm624_vm12, %v496_v32, %v756_v22  ;;  %vm625_vm13 = vcmp.ge.f32.partialorder %v497_v40, 0.0  ;;  %v757_v49 = vmul.f32 %v1434_v29, %v497_v40  ;;  %vm626_vm14 = vcmp.ge.f32.partialorder %v498_v41, 0.0  ;;  %v1361_v32 = vld [vmem:[%s2381_s0 + $0x1b0] sm:$0xff]  }
  0x93   :  { %1012 = vst [vmem:[%s2383_s2 + $0x2e0] sm:$0xff] %v884_v48  ;;  %v758_v50 = vmul.f32 %v1434_v29, %v498_v41  ;;  %v499_v51 = vadd.f32 %v1432_v28, %v367_v42  ;;  %v500_v52 = vadd.f32 %v1432_v28, %v368_v44  ;;  %v369_v53 = vmul.f32 %v1247_v45, %v1430_v27 }
  0x94   :  { %v885_v54 = vsel %vm625_vm13, %v497_v40, %v757_v49  ;;  %v370_v55 = vmul.f32 %v1250_v46, %v1430_v27  ;;  %v1251_v56 = vunpack.c.h.bf16 %v1356_v21  ;;  %v1254_v57 = vunpack.c.l.bf16 %v1357_v47 }
  0x95   :  { %1013 = vst [vmem:[%s2383_s2 + $0x2e8] sm:$0xff] %v885_v54  ;;  %v886_v59 = vsel %vm626_vm14, %v498_v41, %v758_v50  ;;  %vm627_vm15 = vcmp.ge.f32.partialorder %v499_v51, 0.0  ;;  %v759_v60 = vmul.f32 %v1434_v29, %v499_v51  ;;  %vm628_vm0 = vcmp.ge.f32.partialorder %v500_v52, 0.0  ;;  %v1362_v41 = vld [vmem:[%s2381_s0 + $0x1b8] sm:$0xff]  }
  0x96   :  { %1014 = vst [vmem:[%s2383_s2 + $0x2f0] sm:$0xff] %v886_v59  ;;  %v760_v61 = vmul.f32 %v1434_v29, %v500_v52  ;;  %v501_v62 = vadd.f32 %v1432_v28, %v369_v53  ;;  %v502_v63 = vadd.f32 %v1432_v28, %v370_v55  ;;  %v371_v0 = vmul.f32 %v1251_v56, %v1430_v27 }
  0x97   :  { %v887_v1 = vsel %vm627_vm15, %v499_v51, %v759_v60  ;;  %v372_v2 = vmul.f32 %v1254_v57, %v1430_v27  ;;  %v1255_v3 = vunpack.c.h.bf16 %v1357_v47  ;;  %v1258_v4 = vunpack.c.l.bf16 %v1358_v58 }
  0x98   :  { %1015 = vst [vmem:[%s2383_s2 + $0x2f8] sm:$0xff] %v887_v1  ;;  %v888_v6 = vsel %vm628_vm0, %v500_v52, %v760_v61  ;;  %vm629_vm1 = vcmp.ge.f32.partialorder %v501_v62, 0.0  ;;  %v761_v7 = vmul.f32 %v1434_v29, %v501_v62  ;;  %vm630_vm2 = vcmp.ge.f32.partialorder %v502_v63, 0.0  ;;  %v1363_v52 = vld [vmem:[%s2381_s0 + $0x1c0] sm:$0xff]  }
  0x99   :  { %1016 = vst [vmem:[%s2383_s2 + $0x300] sm:$0xff] %v888_v6  ;;  %v762_v8 = vmul.f32 %v1434_v29, %v502_v63  ;;  %v503_v9 = vadd.f32 %v1432_v28, %v371_v0  ;;  %v504_v10 = vadd.f32 %v1432_v28, %v372_v2  ;;  %v373_v11 = vmul.f32 %v1255_v3, %v1430_v27 }
  0x9a   :  { %v889_v12 = vsel %vm629_vm1, %v501_v62, %v761_v7  ;;  %v374_v13 = vmul.f32 %v1258_v4, %v1430_v27  ;;  %v1259_v14 = vunpack.c.h.bf16 %v1358_v58  ;;  %v1262_v15 = vunpack.c.l.bf16 %v1359_v5 }
  0x9b   :  { %1017 = vst [vmem:[%s2383_s2 + $0x308] sm:$0xff] %v889_v12  ;;  %v890_v17 = vsel %vm630_vm2, %v502_v63, %v762_v8  ;;  %vm631_vm3 = vcmp.ge.f32.partialorder %v503_v9, 0.0  ;;  %v763_v18 = vmul.f32 %v1434_v29, %v503_v9  ;;  %vm632_vm4 = vcmp.ge.f32.partialorder %v504_v10, 0.0  ;;  %v1364_v63 = vld [vmem:[%s2381_s0 + $0x1c8] sm:$0xff]  }
  0x9c   :  { %1018 = vst [vmem:[%s2383_s2 + $0x310] sm:$0xff] %v890_v17  ;;  %v764_v19 = vmul.f32 %v1434_v29, %v504_v10  ;;  %v505_v20 = vadd.f32 %v1432_v28, %v373_v11  ;;  %v506_v23 = vadd.f32 %v1432_v28, %v374_v13  ;;  %v375_v24 = vmul.f32 %v1259_v14, %v1430_v27 }
  0x9d   :  { %v891_v25 = vsel %vm631_vm3, %v503_v9, %v763_v18  ;;  %v376_v26 = vmul.f32 %v1262_v15, %v1430_v27  ;;  %v1263_v30 = vunpack.c.h.bf16 %v1359_v5  ;;  %v1266_v31 = vunpack.c.l.bf16 %v1360_v16 }
  0x9e   :  { %1019 = vst [vmem:[%s2383_s2 + $0x318] sm:$0xff] %v891_v25  ;;  %v892_v35 = vsel %vm632_vm4, %v504_v10, %v764_v19  ;;  %vm633_vm5 = vcmp.ge.f32.partialorder %v505_v20, 0.0  ;;  %v765_v36 = vmul.f32 %v1434_v29, %v505_v20  ;;  %vm634_vm6 = vcmp.ge.f32.partialorder %v506_v23, 0.0  ;;  %v1365_v10 = vld [vmem:[%s2381_s0 + $0x1d0] sm:$0xff]  }
  0x9f   :  { %1020 = vst [vmem:[%s2383_s2 + $0x320] sm:$0xff] %v892_v35  ;;  %v766_v37 = vmul.f32 %v1434_v29, %v506_v23  ;;  %v507_v38 = vadd.f32 %v1432_v28, %v375_v24  ;;  %v508_v39 = vadd.f32 %v1432_v28, %v376_v26  ;;  %v377_v21 = vmul.f32 %v1263_v30, %v1430_v27 }
  0xa0   :  { %v893_v33 = vsel %vm633_vm5, %v505_v20, %v765_v36  ;;  %v378_v34 = vmul.f32 %v1266_v31, %v1430_v27  ;;  %v1267_v22 = vunpack.c.h.bf16 %v1360_v16  ;;  %v1270_v40 = vunpack.c.l.bf16 %v1361_v32 }
  0xa1   :  { %1021 = vst [vmem:[%s2383_s2 + $0x328] sm:$0xff] %v893_v33  ;;  %v894_v42 = vsel %vm634_vm6, %v506_v23, %v766_v37  ;;  %vm635_vm7 = vcmp.ge.f32.partialorder %v507_v38, 0.0  ;;  %v767_v43 = vmul.f32 %v1434_v29, %v507_v38  ;;  %vm636_vm8 = vcmp.ge.f32.partialorder %v508_v39, 0.0  ;;  %v1366_v23 = vld [vmem:[%s2381_s0 + $0x1d8] sm:$0xff]  }
  0xa2   :  { %1022 = vst [vmem:[%s2383_s2 + $0x330] sm:$0xff] %v894_v42  ;;  %v768_v44 = vmul.f32 %v1434_v29, %v508_v39  ;;  %v509_v45 = vadd.f32 %v1432_v28, %v377_v21  ;;  %v510_v46 = vadd.f32 %v1432_v28, %v378_v34  ;;  %v379_v47 = vmul.f32 %v1267_v22, %v1430_v27 }
  0xa3   :  { %v895_v48 = vsel %vm635_vm7, %v507_v38, %v767_v43  ;;  %v380_v49 = vmul.f32 %v1270_v40, %v1430_v27  ;;  %v1271_v50 = vunpack.c.h.bf16 %v1361_v32  ;;  %v1274_v51 = vunpack.c.l.bf16 %v1362_v41 }
  0xa4   :  { %1023 = vst [vmem:[%s2383_s2 + $0x338] sm:$0xff] %v895_v48  ;;  %v896_v53 = vsel %vm636_vm8, %v508_v39, %v768_v44  ;;  %vm637_vm9 = vcmp.ge.f32.partialorder %v509_v45, 0.0  ;;  %v769_v54 = vmul.f32 %v1434_v29, %v509_v45  ;;  %vm638_vm10 = vcmp.ge.f32.partialorder %v510_v46, 0.0  ;;  %v1367_v39 = vld [vmem:[%s2381_s0 + $0x1e0] sm:$0xff]  }
  0xa5   :  { %1024 = vst [vmem:[%s2383_s2 + $0x340] sm:$0xff] %v896_v53  ;;  %v770_v55 = vmul.f32 %v1434_v29, %v510_v46  ;;  %v511_v56 = vadd.f32 %v1432_v28, %v379_v47  ;;  %v512_v57 = vadd.f32 %v1432_v28, %v380_v49  ;;  %v381_v58 = vmul.f32 %v1271_v50, %v1430_v27 }
  0xa6   :  { %v897_v59 = vsel %vm637_vm9, %v509_v45, %v769_v54  ;;  %v382_v60 = vmul.f32 %v1274_v51, %v1430_v27  ;;  %v1275_v61 = vunpack.c.h.bf16 %v1362_v41  ;;  %v1278_v62 = vunpack.c.l.bf16 %v1363_v52 }
  0xa7   :  { %1025 = vst [vmem:[%s2383_s2 + $0x348] sm:$0xff] %v897_v59  ;;  %v898_v0 = vsel %vm638_vm10, %v510_v46, %v770_v55  ;;  %vm639_vm11 = vcmp.ge.f32.partialorder %v511_v56, 0.0  ;;  %v771_v1 = vmul.f32 %v1434_v29, %v511_v56  ;;  %vm640_vm12 = vcmp.ge.f32.partialorder %v512_v57, 0.0  ;;  %v1368_v46 = vld [vmem:[%s2381_s0 + $0x1e8] sm:$0xff]  }
  0xa8   :  { %1026 = vst [vmem:[%s2383_s2 + $0x350] sm:$0xff] %v898_v0  ;;  %v772_v2 = vmul.f32 %v1434_v29, %v512_v57  ;;  %v513_v3 = vadd.f32 %v1432_v28, %v381_v58  ;;  %v514_v4 = vadd.f32 %v1432_v28, %v382_v60  ;;  %v383_v5 = vmul.f32 %v1275_v61, %v1430_v27 }
  0xa9   :  { %v899_v6 = vsel %vm639_vm11, %v511_v56, %v771_v1  ;;  %v384_v7 = vmul.f32 %v1278_v62, %v1430_v27  ;;  %v1279_v8 = vunpack.c.h.bf16 %v1363_v52  ;;  %v1282_v9 = vunpack.c.l.bf16 %v1364_v63 }
  0xaa   :  { %1027 = vst [vmem:[%s2383_s2 + $0x358] sm:$0xff] %v899_v6  ;;  %v900_v11 = vsel %vm640_vm12, %v512_v57, %v772_v2  ;;  %vm641_vm13 = vcmp.ge.f32.partialorder %v513_v3, 0.0  ;;  %v773_v12 = vmul.f32 %v1434_v29, %v513_v3  ;;  %vm642_vm14 = vcmp.ge.f32.partialorder %v514_v4, 0.0  ;;  %v1369_v57 = vld [vmem:[%s2381_s0 + $0x1f0] sm:$0xff]  }
  0xab   :  { %1028 = vst [vmem:[%s2383_s2 + $0x360] sm:$0xff] %v900_v11  ;;  %v774_v13 = vmul.f32 %v1434_v29, %v514_v4  ;;  %v515_v14 = vadd.f32 %v1432_v28, %v383_v5  ;;  %v516_v15 = vadd.f32 %v1432_v28, %v384_v7  ;;  %v385_v16 = vmul.f32 %v1279_v8, %v1430_v27 }
  0xac   :  { %v901_v17 = vsel %vm641_vm13, %v513_v3, %v773_v12  ;;  %v386_v18 = vmul.f32 %v1282_v9, %v1430_v27  ;;  %v1283_v19 = vunpack.c.h.bf16 %v1364_v63  ;;  %v1286_v20 = vunpack.c.l.bf16 %v1365_v10 }
  0xad   :  { %1029 = vst [vmem:[%s2383_s2 + $0x368] sm:$0xff] %v901_v17  ;;  %v902_v24 = vsel %vm642_vm14, %v514_v4, %v774_v13  ;;  %vm643_vm15 = vcmp.ge.f32.partialorder %v515_v14, 0.0  ;;  %v775_v25 = vmul.f32 %v1434_v29, %v515_v14  ;;  %vm644_vm0 = vcmp.ge.f32.partialorder %v516_v15, 0.0  ;;  %v1370_v4 = vld [vmem:[%s2381_s0 + $0x1f8] sm:$0xff]  }
  0xae   :  { %1030 = vst [vmem:[%s2383_s2 + $0x370] sm:$0xff] %v902_v24  ;;  %v776_v26 = vmul.f32 %v1434_v29, %v516_v15  ;;  %v517_v30 = vadd.f32 %v1432_v28, %v385_v16  ;;  %v518_v31 = vadd.f32 %v1432_v28, %v386_v18  ;;  %v387_v32 = vmul.f32 %v1283_v19, %v1430_v27 }
  0xaf   :  { %v903_v35 = vsel %vm643_vm15, %v515_v14, %v775_v25  ;;  %v388_v36 = vmul.f32 %v1286_v20, %v1430_v27  ;;  %v1287_v37 = vunpack.c.h.bf16 %v1365_v10  ;;  %v1290_v38 = vunpack.c.l.bf16 %v1366_v23 }
  0xb0   :  { %1031 = vst [vmem:[%s2383_s2 + $0x378] sm:$0xff] %v903_v35  ;;  %v904_v21 = vsel %vm644_vm0, %v516_v15, %v776_v26  ;;  %vm645_vm1 = vcmp.ge.f32.partialorder %v517_v30, 0.0  ;;  %v777_v33 = vmul.f32 %v1434_v29, %v517_v30  ;;  %vm646_vm2 = vcmp.ge.f32.partialorder %v518_v31, 0.0 }
  0xb1   :  { %1032 = vst [vmem:[%s2383_s2 + $0x380] sm:$0xff] %v904_v21  ;;  %v778_v34 = vmul.f32 %v1434_v29, %v518_v31  ;;  %v519_v22 = vadd.f32 %v1432_v28, %v387_v32  ;;  %v520_v40 = vadd.f32 %v1432_v28, %v388_v36  ;;  %v389_v41 = vmul.f32 %v1287_v37, %v1430_v27 }
  0xb2   :  { %v905_v42 = vsel %vm645_vm1, %v517_v30, %v777_v33  ;;  %v390_v43 = vmul.f32 %v1290_v38, %v1430_v27  ;;  %v1291_v44 = vunpack.c.h.bf16 %v1366_v23  ;;  %v1294_v45 = vunpack.c.l.bf16 %v1367_v39 }
  0xb3   :  { %1033 = vst [vmem:[%s2383_s2 + $0x388] sm:$0xff] %v905_v42  ;;  %v906_v47 = vsel %vm646_vm2, %v518_v31, %v778_v34  ;;  %vm647_vm3 = vcmp.ge.f32.partialorder %v519_v22, 0.0  ;;  %v779_v48 = vmul.f32 %v1434_v29, %v519_v22  ;;  %vm648_vm4 = vcmp.ge.f32.partialorder %v520_v40, 0.0 }
  0xb4   :  { %1034 = vst [vmem:[%s2383_s2 + $0x390] sm:$0xff] %v906_v47  ;;  %v780_v49 = vmul.f32 %v1434_v29, %v520_v40  ;;  %v521_v50 = vadd.f32 %v1432_v28, %v389_v41  ;;  %v522_v51 = vadd.f32 %v1432_v28, %v390_v43  ;;  %v391_v52 = vmul.f32 %v1291_v44, %v1430_v27 }
  0xb5   :  { %v907_v53 = vsel %vm647_vm3, %v519_v22, %v779_v48  ;;  %v392_v54 = vmul.f32 %v1294_v45, %v1430_v27  ;;  %v1295_v55 = vunpack.c.h.bf16 %v1367_v39  ;;  %v1298_v56 = vunpack.c.l.bf16 %v1368_v46 }
  0xb6   :  { %1035 = vst [vmem:[%s2383_s2 + $0x398] sm:$0xff] %v907_v53  ;;  %v908_v58 = vsel %vm648_vm4, %v520_v40, %v780_v49  ;;  %vm649_vm5 = vcmp.ge.f32.partialorder %v521_v50, 0.0  ;;  %v781_v59 = vmul.f32 %v1434_v29, %v521_v50  ;;  %vm650_vm6 = vcmp.ge.f32.partialorder %v522_v51, 0.0 }
  0xb7   :  { %1036 = vst [vmem:[%s2383_s2 + $0x3a0] sm:$0xff] %v908_v58  ;;  %v782_v60 = vmul.f32 %v1434_v29, %v522_v51  ;;  %v523_v61 = vadd.f32 %v1432_v28, %v391_v52  ;;  %v524_v62 = vadd.f32 %v1432_v28, %v392_v54  ;;  %v393_v63 = vmul.f32 %v1295_v55, %v1430_v27 }
  0xb8   :  { %v909_v0 = vsel %vm649_vm5, %v521_v50, %v781_v59  ;;  %v394_v1 = vmul.f32 %v1298_v56, %v1430_v27  ;;  %v1299_v2 = vunpack.c.h.bf16 %v1368_v46  ;;  %v1302_v3 = vunpack.c.l.bf16 %v1369_v57 }
  0xb9   :  { %1037 = vst [vmem:[%s2383_s2 + $0x3a8] sm:$0xff] %v909_v0  ;;  %v910_v5 = vsel %vm650_vm6, %v522_v51, %v782_v60  ;;  %vm651_vm7 = vcmp.ge.f32.partialorder %v523_v61, 0.0  ;;  %v783_v6 = vmul.f32 %v1434_v29, %v523_v61  ;;  %vm652_vm8 = vcmp.ge.f32.partialorder %v524_v62, 0.0 }
  0xba   :  { %1038 = vst [vmem:[%s2383_s2 + $0x3b0] sm:$0xff] %v910_v5  ;;  %v784_v7 = vmul.f32 %v1434_v29, %v524_v62  ;;  %v525_v8 = vadd.f32 %v1432_v28, %v393_v63  ;;  %v526_v9 = vadd.f32 %v1432_v28, %v394_v1  ;;  %v395_v10 = vmul.f32 %v1299_v2, %v1430_v27 }
  0xbb   :  { %v911_v11 = vsel %vm651_vm7, %v523_v61, %v783_v6  ;;  %v396_v12 = vmul.f32 %v1302_v3, %v1430_v27  ;;  %v1303_v13 = vunpack.c.h.bf16 %v1369_v57  ;;  %v1306_v14 = vunpack.c.l.bf16 %v1370_v4 }
  0xbc   :  { %1039 = vst [vmem:[%s2383_s2 + $0x3b8] sm:$0xff] %v911_v11  ;;  %v912_v15 = vsel %vm652_vm8, %v524_v62, %v784_v7  ;;  %vm653_vm9 = vcmp.ge.f32.partialorder %v525_v8, 0.0  ;;  %v785_v16 = vmul.f32 %v1434_v29, %v525_v8  ;;  %vm654_vm10 = vcmp.ge.f32.partialorder %v526_v9, 0.0 }
  0xbd   :  { %1040 = vst [vmem:[%s2383_s2 + $0x3c0] sm:$0xff] %v912_v15  ;;  %v786_v17 = vmul.f32 %v1434_v29, %v526_v9  ;;  %v527_v18 = vadd.f32 %v1432_v28, %v395_v10  ;;  %v528_v19 = vadd.f32 %v1432_v28, %v396_v12  ;;  %v397_v20 = vmul.f32 %v1303_v13, %v1430_v27 }
  0xbe   :  { %v913_v23 = vsel %vm653_vm9, %v525_v8, %v785_v16  ;;  %v398_v24 = vmul.f32 %v1306_v14, %v1430_v27  ;;  %v1307_v25 = vunpack.c.h.bf16 %v1370_v4 }
  0xbf   :  { %1041 = vst [vmem:[%s2383_s2 + $0x3c8] sm:$0xff] %v913_v23  ;;  %v914_v26 = vsel %vm654_vm10, %v526_v9, %v786_v17  ;;  %vm655_vm11 = vcmp.ge.f32.partialorder %v527_v18, 0.0  ;;  %v787_v30 = vmul.f32 %v1434_v29, %v527_v18  ;;  %vm656_vm12 = vcmp.ge.f32.partialorder %v528_v19, 0.0 }
  0xc0   :  { %1042 = vst [vmem:[%s2383_s2 + $0x3d0] sm:$0xff] %v914_v26  ;;  %v788_v31 = vmul.f32 %v1434_v29, %v528_v19  ;;  %v529_v32 = vadd.f32 %v1432_v28, %v397_v20  ;;  %v530_v35 = vadd.f32 %v1432_v28, %v398_v24  ;;  %v399_v36 = vmul.f32 %v1307_v25, %v1430_v27 }
  0xc1   :  { %v915_v37 = vsel %vm655_vm11, %v527_v18, %v787_v30 }
  0xc2   :  { %1043 = vst [vmem:[%s2383_s2 + $0x3d8] sm:$0xff] %v915_v37  ;;  %v916_v38 = vsel %vm656_vm12, %v528_v19, %v788_v31  ;;  %vm657_vm13 = vcmp.ge.f32.partialorder %v529_v32, 0.0  ;;  %v789_v39 = vmul.f32 %v1434_v29, %v529_v32  ;;  %vm658_vm14 = vcmp.ge.f32.partialorder %v530_v35, 0.0 }
  0xc3   :  { %1044 = vst [vmem:[%s2383_s2 + $0x3e0] sm:$0xff] %v916_v38  ;;  %v790_v21 = vmul.f32 %v1434_v29, %v530_v35  ;;  %v531_v33 = vadd.f32 %v1432_v28, %v399_v36 }
  0xc4   :  { %v917_v34 = vsel %vm657_vm13, %v529_v32, %v789_v39 }
  0xc5   :  { %1045 = vst [vmem:[%s2383_s2 + $0x3e8] sm:$0xff] %v917_v34  ;;  %v918_v27 = vsel %vm658_vm14, %v530_v35, %v790_v21  ;;  %vm659_vm15 = vcmp.ge.f32.partialorder %v531_v33, 0.0  ;;  %v791_v22 = vmul.f32 %v1434_v29, %v531_v33 }
  0xc6   :  { %1046 = vst [vmem:[%s2383_s2 + $0x3f0] sm:$0xff] %v918_v27 }
  0xc7   :  { %v919_v40 = vsel %vm659_vm15, %v531_v33, %v791_v22 }
  0xc8   :  { %1047 = vst [vmem:[%s2383_s2 + $0x3f8] sm:$0xff] %v919_v40 }

</bundles_post_ra>
